<compile_context>
chip_gen: v7x
topology: tpu7x:2x2x1
jax: 0.10.0
libtpu: 0.0.40
codegen_flags: <defaults>
</compile_context>

<pallas_src>
import functools
import math

import jax
import jax.numpy as jnp
from jax import lax
from jax.experimental import pallas as pl
from jax.experimental.pallas import tpu as pltpu

_NEG_INF = -1e30          # finite "minus infinity": keeps all exp/max arithmetic NaN-free
_NEG_SLOPE = 0.2          # PyG GATConv default LeakyReLU slope
_LANE = 128


def _round_up(n, m):
    return ((n + m - 1) // m) * m


# ---------------------------------------------------------------------------
# Kernel 1: node projection + fused attention-logit matmul (tiled over nodes).
#   x_ref    : [TB, Fin_pad]      node-feature tile
#   w_ref    : [HF_pad, Fin_pad]  linear weight, PyG layout (rows = output features)
#   attc_ref : [128, HF_pad]      rows 0..H-1 = att_dst (block layout), rows H..2H-1 = att_src
#   xp_ref   : [TB, HF_pad]       projected features (compute dtype, streamed by kernel 2)
#   alpha_ref: [TB, 128]          col h = <att_dst_h, xp_h>, col H+h = <att_src_h, xp_h>
# ---------------------------------------------------------------------------
def _gat_project_kernel(x_ref, w_ref, attc_ref, xp_ref, alpha_ref, *, compute_dtype):
    x = x_ref[...].astype(compute_dtype)
    w = w_ref[...].astype(compute_dtype)
    # xp = x @ W^T, transpose folded into the contraction (bf16 operands, f32 accumulate).
    xp = lax.dot_general(x, w, (((1,), (1,)), ((), ())),
                         preferred_element_type=jnp.float32)            # [TB, HF_pad]
    # Both logit families in one MXU op (dst logits in cols 0..H-1, src logits in cols H..2H-1).
    alpha = lax.dot_general(xp, attc_ref[...], (((1,), (1,)), ((), ())),
                            preferred_element_type=jnp.float32)         # [TB, 128]
    xp_ref[...] = xp.astype(xp_ref.dtype)
    alpha_ref[...] = alpha


# ---------------------------------------------------------------------------
# Kernel 2: dense-adjacency GAT attention with online softmax.
#   grid = (dst tiles ["parallel"], src tiles ["arbitrary"]), src axis last.
# ---------------------------------------------------------------------------
def _gat_attention_kernel(alpha_d_ref, alpha_s_ref, xp_ref, adj_ref, hmask_ref, bias_ref,
                          o_ref,
                          alpha_t_ref, m_ref, l_ref, a_ref, acc_ref,
                          *, heads, tile_d, tile_s, compute_dtype, activation, n_valid_out):
    d_idx = pl.program_id(0)
    s_idx = pl.program_id(1)

    @pl.when(s_idx == 0)
    def _():
        m_ref[...] = jnp.full(m_ref.shape, _NEG_INF, m_ref.dtype)
        # l starts at 1 so the untouched (col >= heads) lanes never hit 1/0; the spurious +1
        # in real head columns is annihilated by the exp(-1e30 - m_finite) = 0 rescale the
        # first time a row sees an unmasked entry (guaranteed: self-loops are folded in below).
        l_ref[...] = jnp.full(l_ref.shape, 1.0, l_ref.dtype)
        a_ref[...] = jnp.zeros(a_ref.shape, a_ref.dtype)
        acc_ref[...] = jnp.zeros(acc_ref.shape, acc_ref.dtype)

    # Source-side logits transposed once per tile (XLU); the head loop then reads cheap
    # [1, TBs] sublane slices instead of doing one transpose per head.
    alpha_t_ref[...] = jnp.transpose(alpha_s_ref[...])                   # [128, TBs]

    alpha_d = alpha_d_ref[...]                                            # [TBd, 128] f32
    xp_s = xp_ref[...]                                                    # [TBs, HF_pad]
    m_prev = m_ref[...]                                                   # [TBd, 128] f32
    l_prev = l_ref[...]                                                   # [TBd, 128] f32

    # Edge mask (+ self-loops) as one additive bias shared by every head.
    row_g = d_idx * tile_d + lax.broadcasted_iota(jnp.int32, (tile_d, tile_s), 0)
    col_g = s_idx * tile_s + lax.broadcasted_iota(jnp.int32, (tile_d, tile_s), 1)
    connected = (adj_ref[...].astype(jnp.int32) > 0) | (row_g == col_g)
    edge_bias = jnp.where(connected, 0.0, _NEG_INF)                       # [TBd, TBs] f32

    contrib = jnp.zeros(acc_ref.shape, jnp.float32)
    for h in range(heads):  # static unroll; heads is 15 or 1, per-head temporaries die each iter
        m_old = m_prev[:, h:h + 1]                                        # [TBd, 1]
        s_log = alpha_d[:, h:h + 1] + alpha_t_ref[heads + h:heads + h + 1, :]
        s_log = jnp.where(s_log > 0.0, s_log, _NEG_SLOPE * s_log) + edge_bias
        m_new = jnp.maximum(m_old, jnp.max(s_log, axis=1, keepdims=True))
        a_h = jnp.exp(m_old - m_new)                                      # online-softmax rescale
        p = jnp.exp(s_log - m_new)                                        # [TBd, TBs]
        m_ref[:, h:h + 1] = m_new
        l_ref[:, h:h + 1] = a_h * l_prev[:, h:h + 1] + jnp.sum(p, axis=1, keepdims=True)
        a_ref[:, h:h + 1] = a_h
        # One-hot head-row mask keeps the aggregation matmul 128-lane dense while only head h's
        # feature columns receive a contribution.
        xp_h = xp_s * hmask_ref[h:h + 1, :].astype(compute_dtype)
        contrib = contrib + jnp.dot(p.astype(compute_dtype), xp_h,
                                    preferred_element_type=jnp.float32)

    # Single rescale of the running aggregate for all heads: per-head factors expanded to the
    # head-block column layout with one small matmul.
    rescale = jnp.dot(a_ref[...], hmask_ref[...], preferred_element_type=jnp.float32)
    acc_ref[...] = acc_ref[...] * rescale + contrib

    @pl.when(s_idx == pl.num_programs(1) - 1)
    def _():
        # Normalize AFTER aggregation: EUP reciprocal + one [TBd,128]x[128,HF] matmul instead
        # of a per-head [N, N] divide.
        inv_l = jnp.dot(pl.reciprocal(l_ref[...], approx=True), hmask_ref[...],
                        preferred_element_type=jnp.float32)               # [TBd, HF_pad]
        out = acc_ref[...] * inv_l + bias_ref[...]
        if activation == "relu":
            out = jnp.maximum(out, 0.0)
        elif activation == "log_softmax":
            col = lax.broadcasted_iota(jnp.int32, out.shape, 1)
            valid = col < n_valid_out
            logits = jnp.where(valid, out, _NEG_INF)
            mx = jnp.max(logits, axis=1, keepdims=True)
            sh = logits - mx
            lse = jnp.log(jnp.sum(jnp.where(valid, jnp.exp(sh), 0.0),
                                  axis=1, keepdims=True))
            out = sh - lse
        o_ref[...] = out.astype(o_ref.dtype)


# ---------------------------------------------------------------------------
# One GAT layer = projection call + attention call.
# ---------------------------------------------------------------------------
def _gat_layer_apply(x_pad, adj_i8, layer, activation, *, compute_dtype, tile,
                     vmem_limit_bytes):
    n_pad = adj_i8.shape[0]
    fin_pad = layer["fin_pad"]
    hf_pad = layer["hf_pad"]
    nt = n_pad // tile

    cparams_1d = pltpu.CompilerParams(dimension_semantics=("parallel",),
                                      vmem_limit_bytes=vmem_limit_bytes)
    cparams_2d = pltpu.CompilerParams(dimension_semantics=("parallel", "arbitrary"),
                                      vmem_limit_bytes=vmem_limit_bytes)

    xp, alpha = pl.pallas_call(
        functools.partial(_gat_project_kernel, compute_dtype=compute_dtype),
        grid=(nt,),
        in_specs=[pl.BlockSpec((tile, fin_pad), lambda i: (i, 0)),
                  pl.BlockSpec((hf_pad, fin_pad), lambda i: (0, 0)),
                  pl.BlockSpec((_LANE, hf_pad), lambda i: (0, 0))],
        out_specs=[pl.BlockSpec((tile, hf_pad), lambda i: (i, 0)),
                   pl.BlockSpec((tile, _LANE), lambda i: (i, 0))],
        out_shape=[jax.ShapeDtypeStruct((n_pad, hf_pad), compute_dtype),
                   jax.ShapeDtypeStruct((n_pad, _LANE), jnp.float32)],
        compiler_params=cparams_1d,
    )(x_pad, layer["w"], layer["att_cat"])

    out = pl.pallas_call(
        functools.partial(_gat_attention_kernel, heads=layer["heads"],
                          tile_d=tile, tile_s=tile, compute_dtype=compute_dtype,
                          activation=activation, n_valid_out=layer["hf"]),
        grid=(nt, nt),
        in_specs=[pl.BlockSpec((tile, _LANE), lambda d, s: (d, 0)),     # alpha (dst rows)
                  pl.BlockSpec((tile, _LANE), lambda d, s: (s, 0)),     # alpha (src rows)
                  pl.BlockSpec((tile, hf_pad), lambda d, s: (s, 0)),    # xp (src rows)
                  pl.BlockSpec((tile, tile), lambda d, s: (d, s)),      # int8 adjacency tile
                  pl.BlockSpec((_LANE, hf_pad), lambda d, s: (0, 0)),   # one-hot head mask
                  pl.BlockSpec((1, hf_pad), lambda d, s: (0, 0))],      # bias
        out_specs=pl.BlockSpec((tile, hf_pad), lambda d, s: (d, 0)),
        out_shape=jax.ShapeDtypeStruct((n_pad, hf_pad), jnp.float32),
        scratch_shapes=[pltpu.VMEM((_LANE, tile), jnp.float32),   # alpha_src transposed
                        pltpu.VMEM((tile, _LANE), jnp.float32),   # running max m (per head col)
                        pltpu.VMEM((tile, _LANE), jnp.float32),   # running denom l
                        pltpu.VMEM((tile, _LANE), jnp.float32),   # per-step rescale factors
                        pltpu.VMEM((tile, hf_pad), jnp.float32)], # running aggregate
        compiler_params=cparams_2d,
    )(alpha, alpha, xp, adj_i8, layer["hmask"], layer["bias"])
    return out


# ---------------------------------------------------------------------------
# Parameter construction (padding / layout done ONCE here, never per forward call).
# ---------------------------------------------------------------------------
def init_net_gat_params(key, nfeat, nhid, nclass, heads=15):
    def glorot(k, shape, fan_in, fan_out):
        limit = math.sqrt(6.0 / (fan_in + fan_out))
        return jax.random.uniform(k, shape, jnp.float32, -limit, limit)

    def make_layer(k, fin, fout, h):
        assert 2 * h <= _LANE
        kw, ks, kd, kb = jax.random.split(k, 4)
        hf = h * fout
        w = glorot(kw, (hf, fin), fin, hf)
        att_src = glorot(ks, (h, fout), fout, 1)
        att_dst = glorot(kd, (h, fout), fout, 1)
        bias = jax.random.uniform(kb, (hf,), jnp.float32, -0.1, 0.1)

        fin_pad = _round_up(fin, _LANE)
        hf_pad = _round_up(hf, _LANE)
        w_pad = jnp.zeros((hf_pad, fin_pad), jnp.float32).at[:hf, :fin].set(w)
        att_cat = jnp.zeros((_LANE, hf_pad), jnp.float32)   # rows 0..h-1: dst, rows h..2h-1: src
        hmask = jnp.zeros((_LANE, hf_pad), jnp.float32)     # row i: one-hot over head i's columns
        for i in range(h):
            att_cat = att_cat.at[i, i * fout:(i + 1) * fout].set(att_dst[i])
            att_cat = att_cat.at[h + i, i * fout:(i + 1) * fout].set(att_src[i])
            hmask = hmask.at[i, i * fout:(i + 1) * fout].set(1.0)
        b_pad = jnp.zeros((1, hf_pad), jnp.float32).at[0, :hf].set(bias)
        return dict(w=w_pad, att_cat=att_cat, hmask=hmask, bias=b_pad,
                    heads=h, fout=fout, hf=hf, fin=fin, fin_pad=fin_pad, hf_pad=hf_pad,
                    # raw params kept only for the pure-JAX reference check
                    w_raw=w, att_src_raw=att_src, att_dst_raw=att_dst, bias_raw=bias)

    k1, k2, k3 = jax.random.split(key, 3)
    return dict(
        l1=make_layer(k1, nfeat, nhid, heads),
        l2=make_layer(k2, nhid * heads, nhid, heads),
        l3=make_layer(k3, nhid * heads, nclass, 1),
        nclass=nclass,
    )


def net_gat_forward(params, x, adj, *, compute_dtype=jnp.bfloat16, node_tile=128,
                    vmem_limit_bytes=48 * 1024 * 1024):
    """x: [N, nfeat] f32, adj: [N, N] dense adjacency -> [N, nclass] log-probs."""
    assert node_tile % _LANE == 0
    n, f = x.shape
    assert f == params["l1"]["fin"]
    n_pad = _round_up(n, node_tile)

    # int8 adjacency: only ever compared against zero inside the kernel; self-loops are
    # folded in-kernel, so no max(adj, eye) array is materialized in HBM.
    adj_i8 = jnp.zeros((n_pad, n_pad), jnp.int8).at[:n, :n].set((adj > 0).astype(jnp.int8))
    h = jnp.zeros((n_pad, params["l1"]["fin_pad"]), jnp.float32).at[:n, :f].set(x)

    # TODO(synk): GATConv attention dropout (p=0.05) is training-only; eval forward is identity.
    kw = dict(compute_dtype=compute_dtype, tile=node_tile, vmem_limit_bytes=vmem_limit_bytes)
    h = _gat_layer_apply(h, adj_i8, params["l1"], "relu", **kw)
    h = _gat_layer_apply(h, adj_i8, params["l2"], "relu", **kw)
    h = _gat_layer_apply(h, adj_i8, params["l3"], "log_softmax", **kw)
    return h[:n, :params["nclass"]]


# ---------------------------------------------------------------------------
# Pure-JAX reference (same dense-adjacency GAT semantics) for correctness check.
# ---------------------------------------------------------------------------
def _gat_layer_ref(x, adj, w, att_src, att_dst, bias, heads, fout):
    n = x.shape[0]
    xp = (x @ w.T).reshape(n, heads, fout)
    a_src = jnp.einsum("nhf,hf->nh", xp, att_src)
    a_dst = jnp.einsum("nhf,hf->nh", xp, att_dst)
    s = a_dst[:, None, :] + a_src[None, :, :]            # [dst i, src j, head]
    s = jnp.where(s > 0, s, _NEG_SLOPE * s)
    s = jnp.where(adj[:, :, None] > 0, s, -jnp.inf)
    attn = jax.nn.softmax(s, axis=1)
    out = jnp.einsum("ijh,jhf->ihf", attn, xp).reshape(n, heads * fout)
    return out + bias


def net_gat_ref(params, x, adj):
    n = x.shape[0]
    adj_sl = jnp.maximum(adj, jnp.eye(n, dtype=adj.dtype))

    def layer(h, lp):
        return _gat_layer_ref(h, adj_sl, lp["w_raw"], lp["att_src_raw"],
                              lp["att_dst_raw"], lp["bias_raw"], lp["heads"], lp["fout"])

    h = jax.nn.relu(layer(x, params["l1"]))
    h = jax.nn.relu(layer(h, params["l2"]))
    h = layer(h, params["l3"])
    return jax.nn.log_softmax(h, axis=1)


if __name__ == "__main__":
    # Make the JAX reference (and in-kernel f32 matmuls) full precision so the check is meaningful.
    jax.config.update("jax_default_matmul_precision", "highest")

    # 200 nodes -> N_pad = 256 with 128-node tiles: exercises the 2x2 grid, the online softmax
    # across multiple src tiles, and the padded-row/column handling.
    n_nodes, nfeat, nhid, nclass, heads = 200, 32, 8, 4, 15
    key = jax.random.PRNGKey(0)
    kp, kx, ka = jax.random.split(key, 3)

    params = init_net_gat_params(kp, nfeat, nhid, nclass, heads=heads)
    x = jax.random.normal(kx, (n_nodes, nfeat), jnp.float32)
    adj = (jax.random.uniform(ka, (n_nodes, n_nodes)) < 0.3).astype(jnp.float32)

    ref = net_gat_ref(params, x, adj)

    # f32 MXU-operand path: tight check of the tiled online-softmax algorithm.
    out_f32 = jax.block_until_ready(
        net_gat_forward(params, x, adj, compute_dtype=jnp.float32))
    assert out_f32.shape == (n_nodes, nclass)
    assert jnp.allclose(out_f32, ref, atol=3e-2, rtol=3e-2)
    assert jnp.allclose(jnp.exp(out_f32).sum(axis=1), 1.0, atol=1e-4)

    # bf16 MXU-operand path (default / perf path): looser tolerance vs the f32 reference.
    out = jax.block_until_ready(net_gat_forward(params, x, adj))
    assert out.shape == (n_nodes, nclass)
    assert jnp.allclose(out, ref, atol=1e-1, rtol=1e-1)
    assert jnp.allclose(jnp.exp(out).sum(axis=1), 1.0, atol=1e-4)

    print("KERNEL_OK")
</pallas_src>

<mosaic_0001>
module attributes {stable_mosaic.version = 11 : i64} {
  func.func @_gat_project_kernel(%arg0: i32, %arg1: memref<128x128xf32, #tpu.memory_space<vmem>>, %arg2: memref<128x128xf32, #tpu.memory_space<vmem>>, %arg3: memref<128x128xf32, #tpu.memory_space<vmem>>, %arg4: memref<128x128xf32, #tpu.memory_space<vmem>>, %arg5: memref<128x128xf32, #tpu.memory_space<vmem>>) attributes {dimension_semantics = [#tpu.dimension_semantics<parallel>], iteration_bounds = array<i64: 2>, scalar_prefetch = 0 : i64, scratch_operands = 0 : i64, tpu.core_type = #tpu.core_type<tc>, window_params = [{transform_indices = @transform_0, window_bounds = array<i64: 128, 128>}, {pipeline_mode = #tpu.pipeline_mode<synchronous>, transform_indices = @transform_1, window_bounds = array<i64: 128, 128>}, {pipeline_mode = #tpu.pipeline_mode<synchronous>, transform_indices = @transform_2, window_bounds = array<i64: 128, 128>}, {transform_indices = @transform_3, window_bounds = array<i64: 128, 128>}, {transform_indices = @transform_4, window_bounds = array<i64: 128, 128>}]} {
    %c0 = arith.constant 0 : index
    %c0_0 = arith.constant 0 : index
    %0 = vector.load %arg1[%c0, %c0_0] : memref<128x128xf32, #tpu.memory_space<vmem>>, vector<128x128xf32>
    %c0_1 = arith.constant 0 : index
    %c0_2 = arith.constant 0 : index
    %1 = vector.load %arg2[%c0_1, %c0_2] : memref<128x128xf32, #tpu.memory_space<vmem>>, vector<128x128xf32>
    %cst = arith.constant dense<0.000000e+00> : vector<128x128xf32>
    %2 = tpu.matmul %0, %1, %cst {dimension_numbers = #tpu.dot_dimension_numbers<[1], [1], [0], [0], [0, 0, 1, 0], [], []>, precision = #tpu.contract_precision<fp32>} : vector<128x128xf32>, vector<128x128xf32>, vector<128x128xf32> -> vector<128x128xf32>
    %c0_3 = arith.constant 0 : index
    %c0_4 = arith.constant 0 : index
    %3 = vector.load %arg3[%c0_3, %c0_4] : memref<128x128xf32, #tpu.memory_space<vmem>>, vector<128x128xf32>
    %cst_5 = arith.constant dense<0.000000e+00> : vector<128x128xf32>
    %4 = tpu.matmul %2, %3, %cst_5 {dimension_numbers = #tpu.dot_dimension_numbers<[1], [1], [0], [0], [0, 0, 1, 0], [], []>, precision = #tpu.contract_precision<fp32>} : vector<128x128xf32>, vector<128x128xf32>, vector<128x128xf32> -> vector<128x128xf32>
    %c0_6 = arith.constant 0 : index
    %c0_7 = arith.constant 0 : index
    %5 = vector.load %arg4[%c0_6, %c0_7] : memref<128x128xf32, #tpu.memory_space<vmem>>, vector<128x128xf32>
    tpu.vector_store %arg4[%c0_6, %c0_7], %2 {strides = array<i32>} : memref<128x128xf32, #tpu.memory_space<vmem>>, vector<128x128xf32>,
    %c0_8 = arith.constant 0 : index
    %c0_9 = arith.constant 0 : index
    %6 = vector.load %arg5[%c0_8, %c0_9] : memref<128x128xf32, #tpu.memory_space<vmem>>, vector<128x128xf32>
    tpu.vector_store %arg5[%c0_8, %c0_9], %4 {strides = array<i32>} : memref<128x128xf32, #tpu.memory_space<vmem>>, vector<128x128xf32>,
    return
  }
  func.func @transform_0(%arg0: i32) -> (i32, i32) {
    %c0_i32 = arith.constant 0 : i32
    %c0_i32_0 = arith.constant 0 : i32
    return %arg0, %c0_i32 : i32, i32
  }
  func.func @transform_1(%arg0: i32) -> (i32, i32) {
    %c0_i32 = arith.constant 0 : i32
    %c0_i32_0 = arith.constant 0 : i32
    %c0_i32_1 = arith.constant 0 : i32
    return %c0_i32, %c0_i32_0 : i32, i32
  }
  func.func @transform_2(%arg0: i32) -> (i32, i32) {
    %c0_i32 = arith.constant 0 : i32
    %c0_i32_0 = arith.constant 0 : i32
    %c0_i32_1 = arith.constant 0 : i32
    return %c0_i32, %c0_i32_0 : i32, i32
  }
  func.func @transform_3(%arg0: i32) -> (i32, i32) {
    %c0_i32 = arith.constant 0 : i32
    %c0_i32_0 = arith.constant 0 : i32
    return %arg0, %c0_i32 : i32, i32
  }
  func.func @transform_4(%arg0: i32) -> (i32, i32) {
    %c0_i32 = arith.constant 0 : i32
    %c0_i32_0 = arith.constant 0 : i32
    return %arg0, %c0_i32 : i32, i32
  }
}

</mosaic_0001>

<bundles_post_ra>
// kernel: tpu_custom_call.1
= control target key start
LH: loop header
LB: loop body
LE: loop exit
PB: predicated region body
PF: predicated region fallthrough
CT: control target
= control target key end

     0   :  { %10 = vsyncpa [#allocation3], 0  ;;  %s6392_s0 = inlined_call_operand.hbm [shape: f32[256,128], index: 0, kind: input, shape index: {}]   ;;  %s6393_s1 = inlined_call_operand.hbm [shape: f32[128,128], index: 1, kind: input, shape index: {}]   ;;  %s6394_s2 = inlined_call_operand.hbm [shape: f32[128,128], index: 2, kind: input, shape index: {}]   ;;  %s6395_s3 = inlined_call_operand.hbm [shape: f32[256,128], index: 3, kind: output, shape index: {0}]   ;;  %s6396_s4 = inlined_call_operand.hbm [shape: f32[256,128], index: 4, kind: output, shape index: {1}]  }
   0x1   :  { %12 = vsyncpa [#allocation3 + $0x1], 0 }
   0x2   :  { %13 = vsyncpa [#allocation6], 0 }
   0x3   :  { %14 = vsyncpa [#allocation4], 0 }
   0x4   :  { %16 = vsyncpa [#allocation4 + $0x1], 0 }
   0x5   :  { %17 = vsyncpa [#allocation10], 0 }
   0x6   :  { %19 = vsyncpa [#allocation10 + $0x1], 0  ;;  %s4995_s15 = smov 0   ;;  %s4997_s16 = smov 0  }
   0x7   :  { %s4999_s17 = smov 0   ;;  %s5001_s18 = smov 0  }
   0x8 LB: > { %s5016_s19 = sadd.s32 4294967295, %s4959_s18   ;;  %s3070_s20 = sadd.s32 4294967294, %s4959_s18   ;;  %s4959_s18 = sphi %s5001_s18, %s6642_s18   ;;  %s4955_s17 = sphi %s4999_s17, %s6641_s17   ;;  %s4951_s16 = sphi %s4997_s16, %s6640_s16   ;;  %s4947_s15 = sphi %s4995_s15, %s6639_s15  }
   0x9   : > { %p45_p0 = scmp.ne.s32.totalorder %s4951_s16, %s4947_s15  ;;  %p6397_p1 = scmp.eq.s32.totalorder %s5016_s19, 0 }
   0xa   : > { %p117_p3 = scmp.eq.s32.totalorder %s3070_s20, 1  ;;  %p3071_p5 = scmp.ge.s32.totalorder %s4959_s18, 1 }
   0xb   : > { %p5025_p4 = por %p6397_p1, %p45_p0  ;;  %p150_p7 = scmp.lt.s32.totalorder %s4959_s18, 3 }
   0xc   : > { %p5030_p6 = por %p117_p3, %p45_p0  ;;  %s4961_s24 = smov [#allocation5]  }
   0xd   : > { %s6489_s21 = scalar_select %p5025_p4, 1, 0 }
   0xe   : > { %s6490_s22 = scalar_select %p5030_p6, 1, 0 }
   0xf   : > { %p5035_p8 = pnand %p3071_p5, %p150_p7  ;;  %s162_s25 = sshll.u32 %s4961_s24, 4  ;;  %s5039_s25 = int_to_ptr.vmem [resolvable:$true] %s162_s25 }
  0x10   : > { %s4962_s27 = smov [#allocation7]   ;;  %s4771_s5 = scalar_lea.hbm %s6393_s1, 2048 }
  0x11   : > { %p4709_p9 = pneg %p5035_p8  ;;  %s175_s28 = sshll.u32 %s4962_s27, 4  ;;  %s5050_s28 = int_to_ptr.vmem [resolvable:$true] %s175_s28 }
  0x12   : > { %p4772_p12 = scmp.ne.s32.totalorder %s6393_s1, %s4771_s5  ;;  %p4778_p5 = scmp.lt.u32.totalorder %s4771_s5, %s6393_s1 }
  0x13   : > { %p5046_p11 = pnand %p4709_p9, %p6397_p1 }
  0x15   : > { %p4773_p13 = pneg %p5046_p11 }
  0x17   : > { %p4774_p0 = pnand %p4773_p13, %p4772_p12 }
  0x19   : > { %p4775_p3 = pneg %p4774_p0 }
  0x1b   : > { %p4780_p7 = pnand %p4778_p5, %p4775_p3 }
  0x1d   : > { %4783 = shalt.err (!%p4780_p7)
}
  0x1e   : > { %s4784_s10 = scalar_lea.vmem %s5039_s25, 2048  ;;  %p4792_p2 = scmp.lt.s32.totalorder %s5039_s25, %s5039_s25 }
  0x1f   : > { %p4785_p9 = scmp.ne.s32.totalorder %s5039_s25, %s4784_s10  ;;  %p4793_p12 = scmp.lt.s32.totalorder %s4784_s10, %s4784_s10 }
  0x21   : > { %p4787_p10 = pnand %p4785_p9, %p4773_p13  ;;  %p4794_p0 = por %p4793_p12, %p4792_p2 }
  0x23   : > { %p4788_p1 = pneg %p4787_p10 }
  0x25   : > { %p4795_p6 = pnand %p4794_p0, %p4788_p1 }
  0x27   : > { %4798 = shalt.err (!%p4795_p6)
}
  0x28   : > { %s4963_s11 = smov 128   ;;  %s4964_s12 = smov 8  }
  0x29   : > { %4712 = dma.hbm_to_vmem [thread:$0]  (!%p5046_p11), %s6393_s1, 2048, %s5039_s25, [#allocation6], %s4963_s11, %s4963_s11, %s4964_s12  }
  0x2a   : > { %s4799_s27 = scalar_lea.hbm %s6394_s2, 2048 }
  0x2b   : > { %p4800_p1 = scmp.ne.s32.totalorder %s6394_s2, %s4799_s27  ;;  %p4806_p10 = scmp.lt.u32.totalorder %s4799_s27, %s6394_s2 }
  0x2d   : > { %p4802_p2 = pnand %p4800_p1, %p4773_p13 }
  0x2f   : > { %p4803_p6 = pneg %p4802_p2 }
  0x31   : > { %p4808_p3 = pnand %p4806_p10, %p4803_p6 }
  0x33   : > { %4811 = shalt.err (!%p4808_p3)
}
  0x34   : > { %s4812_s25 = scalar_lea.vmem %s5050_s28, 2048  ;;  %p4820_p12 = scmp.lt.s32.totalorder %s5050_s28, %s5050_s28 }
  0x35   : > { %p4813_p5 = scmp.ne.s32.totalorder %s5050_s28, %s4812_s25  ;;  %p4821_p0 = scmp.lt.s32.totalorder %s4812_s25, %s4812_s25 }
  0x37   : > { %p4815_p7 = pnand %p4813_p5, %p4773_p13  ;;  %p4822_p1 = por %p4821_p0, %p4820_p12 }
  0x39   : > { %p4816_p9 = pneg %p4815_p7 }
  0x3b   : > { %p4823_p2 = pnand %p4822_p1, %p4816_p9 }
  0x3d   : > { %4826 = shalt.err (!%p4823_p2)
}
  0x3e   : > { %4715 = dma.hbm_to_vmem [thread:$0]  (!%p5046_p11), %s6394_s2, 2048, %s5050_s28, [#allocation6], %s4963_s11, %s4963_s11, %s4964_s12  }
  0x3f   : > { %s5111_s26 = sadd.s32 1, %s4959_s18   ;;  %s32_s9 = sadd.s32 1, %s4955_s17 }
  0x40   : > { %s29_s10 = ssub.s32 %s4959_s18, %s5111_s26  ;;  %p39_p13 = scmp.ne.s32.totalorder %s4955_s17, %s4951_s16 }
  0x41   : > { %p30_p6 = scmp.eq.s32.totalorder %s29_s10, 0  ;;  %p40_p10 = scmp.eq.s32.totalorder %s4959_s18, 0 }
  0x42   : > { %p6493_p3 = scmp.eq.s32.totalorder %s5016_s19, 1  ;;  %p4729_p7 = scmp.lt.s32.totalorder %s4959_s18, 2 }
  0x43   : > { %s5127_s14 = scalar_select %p30_p6, %s4955_s17, %s32_s9  }
  0x44   : > { %p5121_p5 = por %p6493_p3, %p39_p13  ;;  %p41_p9 = por %p40_p10, %p39_p13 }
  0x45   : > { %s189_s20 = sand.u32 1, %s4955_s17   ;;  %s3092_s28 = sshll.u32 %s4959_s18, 11 }
  0x46   : > { %s6494_s13 = scalar_select %p5121_p5, 1, 0 }
  0x47   : > { %s3075_s24 = sshll.u32 %s189_s20, 7  ;;  %s5134_s30 = scalar_lea.hbm %s6392_s0, %s3092_s28 }
  0x48   : > { %s193_s5 = scalar_lea.vmem [#allocation2], %s3075_s24  ;;  %p5138_p11 = pnand %p4729_p7, %p41_p9 }
  0x49   : > { %s200_s6 = sshll.u32 %s193_s5, 4  ;;  %s5142_s7 = scalar_lea.sflag [#allocation3], %s189_s20  ;;  %s5136_s6 = int_to_ptr.vmem [resolvable:$true] %s200_s6 }
  0x4a   : > { %s4827_s8 = scalar_lea.hbm %s5134_s30, 2048  ;;  %p4829_p0 = pneg %p5138_p11 }
  0x4b   : > { %p4828_p12 = scmp.ne.s32.totalorder %s5134_s30, %s4827_s8  ;;  %s4832_s24 = scalar_lea.hbm %s6392_s0, 4096 }
  0x4c   : > { %p4833_p13 = scmp.lt.u32.totalorder %s5134_s30, %s6392_s0  ;;  %p4834_p6 = scmp.lt.u32.totalorder %s4832_s24, %s4827_s8 }
  0x4d   : > { %p4830_p1 = pnand %p4829_p0, %p4828_p12  ;;  %p4836_p3 = scmp.lt.u32.totalorder %s4827_s8, %s5134_s30 }
  0x4e   : > { %p4835_p10 = por %p4834_p6, %p4833_p13 }
  0x4f   : > { %p4831_p2 = pneg %p4830_p1 }
  0x50   : > { %p4837_p7 = por %p4836_p3, %p4835_p10 }
  0x52   : > { %p4838_p9 = pnand %p4837_p7, %p4831_p2 }
  0x54   : > { %4841 = shalt.err (!%p4838_p9)
}
  0x55   : > { %s4842_s20 = scalar_lea.vmem %s5136_s6, 2048  ;;  %s4965_s29 = smov [#allocation2]  }
  0x56   : > { %p4843_p12 = scmp.ne.s32.totalorder %s5136_s6, %s4842_s20  ;;  %s4847_s5 = sshll.u32 %s4965_s29, 4  ;;  %s4848_s5 = int_to_ptr.vmem [resolvable:$false] %s4847_s5 }
  0x57   : > { %s4849_s9 = scalar_lea.vmem %s4848_s5, 4096  ;;  %p4850_p4 = scmp.lt.s32.totalorder %s5136_s6, %s4848_s5 }
  0x58   : > { %p4845_p1 = pnand %p4843_p12, %p4829_p0  ;;  %p4851_p13 = scmp.lt.s32.totalorder %s4849_s9, %s4842_s20 }
  0x5a   : > { %p4846_p5 = pneg %p4845_p1  ;;  %p4852_p6 = por %p4851_p13, %p4850_p4 }
  0x5c   : > { %p4853_p10 = pnand %p4852_p6, %p4846_p5 }
  0x5e   : > { %4856 = shalt.err (!%p4853_p10)
}
  0x5f   : > { %4719 = dma.hbm_to_vmem [thread:$0]  (!%p5138_p11), %s5134_s30, 2048, %s5136_s6, %s5142_s7, %s4963_s11, %s4963_s11, %s4964_s12  }
  0x60   : > { %212 = sbr.rel (%p5035_p8) target bundleno = 1299 (0x513), region = 32 }
  0x67   : > { %s5176_s8 = sand.u32 1, %s4951_s16   ;;  %p6496_p4 = scmp.ne.s32.totalorder %s6489_s21, 0 }
  0x68   : > { %s5179_s10 = sshll.u32 %s5176_s8, 7  ;;  %s215_s25 = scalar_lea.sflag [#allocation3], %s5176_s8 }
  0x69   : > { %s5183_s24 = scalar_lea.vmem [#allocation2], %s5179_s10 }
  0x6a   : > { %4930 = dma.done.wait (%p6496_p4), %s215_s25, 2048  }
  0x6b   : > { %4932 = vsyncadd (%p6496_p4), %s215_s25, 4294965248  ;;  %p6497_p5 = scmp.eq.s32.totalorder %s5016_s19, 0 }
  0x6d   : > { %4934 = dma.done.wait (%p6497_p5), [#allocation6], 4096   ;;  %p6498_p8 = pmov %p6497_p5 }
  0x6e   : > { %v275_v0 = vld [vmem:[#allocation5] sm:$0xff]  ;;  %v276_v1 = vld [vmem:[#allocation5 + $0x8] sm:$0xff]  ;;  %v277_v2 = vld [vmem:[#allocation5 + $0x10] sm:$0xff]  ;;  %s5837_s21 = scalar_lea.vmem [#allocation8], %s5179_s10  ;;  %s3093_s23 = sshll.u32 %s5016_s19, 11 }
  0x6f   : > { %4936 = vsyncadd (%p6498_p8), [#allocation6], 4294963200  ;;  %v292_v3 = vand.u32 4294901760, %v275_v0  ;;  %v295_v4 = vand.u32 4294901760, %v276_v1  ;;  %v278_v5 = vld [vmem:[#allocation5 + $0x18] sm:$0xff]  ;;  %v298_v6 = vand.u32 4294901760, %v277_v2  ;;  %s6287_s6 = scalar_lea.hbm %s6395_s3, %s3093_s23 }
  0x70   : > { %v301_v7 = vand.u32 4294901760, %v278_v5  ;;  %v279_v10 = vld [vmem:[#allocation5 + $0x20] sm:$0xff]  ;;  %v280_v11 = vld [vmem:[#allocation5 + $0x28] sm:$0xff]  ;;  %v281_v19 = vld [vmem:[#allocation5 + $0x30] sm:$0xff]  ;;  %s2930_s11 = sshll.u32 %s5837_s21, 4  ;;  %s2912_s7 = scalar_lea.sflag [#allocation4], %s5176_s8  ;;  %s6289_s11 = int_to_ptr.vmem [resolvable:$true] %s2930_s11 }
  0x71   : > { %v5193_v8 = vpack.c.bf16 %v295_v4, %v292_v3  ;;  %v259_v12 = vld [vmem:[%s5183_s24] sm:$0xff]  ;;  %v304_v14 = vand.u32 4294901760, %v279_v10  ;;  %v307_v15 = vand.u32 4294901760, %v280_v11  ;;  %v282_v20 = vld [vmem:[#allocation5 + $0x38] sm:$0xff]  ;;  %v310_v23 = vand.u32 4294901760, %v281_v19  ;;  %v284_v27 = vld [vmem:[#allocation5 + $0x48] sm:$0xff] }
  0x72   : > { %v5195_v9 = vpack.c.bf16 %v301_v7, %v298_v6  ;;  %v5200_v13 = vand.u32 4294901760, %v259_v12  ;;  %v313_v24 = vand.u32 4294901760, %v282_v20  ;;  %v283_v26 = vld [vmem:[#allocation5 + $0x40] sm:$0xff]  ;;  %v319_v29 = vand.u32 4294901760, %v284_v27  ;;  %v285_v31 = vld [vmem:[#allocation5 + $0x50] sm:$0xff]  ;;  %v286_v32 = vld [vmem:[#allocation5 + $0x58] sm:$0xff] }
  0x73   : > { %4152 = vmatprep.subr.bf16.mxu0 %v5193_v8  ;;  %v5207_v18 = vpack.c.bf16 %v307_v15, %v304_v14  ;;  %v316_v28 = vand.u32 4294901760, %v283_v26  ;;  %v322_v33 = vand.u32 4294901760, %v285_v31  ;;  %v325_v34 = vand.u32 4294901760, %v286_v32  ;;  %v287_v35 = vld [vmem:[#allocation5 + $0x60] sm:$0xff]  ;;  %v288_v36 = vld [vmem:[#allocation5 + $0x68] sm:$0xff]  ;;  %v289_v54 = vld [vmem:[#allocation5 + $0x70] sm:$0xff] }
  0x74   : > { %4154 = vmatpush3.bf16.xpose.msra.mxu0 %v5193_v8  ;;  %v5204_v16 = vsub.f32 %v259_v12, %v5200_v13  ;;  %v5214_v25 = vpack.c.bf16 %v313_v24, %v310_v23  ;;  %v328_v38 = vand.u32 4294901760, %v287_v35  ;;  %v331_v39 = vand.u32 4294901760, %v288_v36  ;;  %v290_v55 = vld [vmem:[#allocation5 + $0x78] sm:$0xff]  ;;  %v260_v61 = vld [vmem:[%s5183_s24 + $0x8] sm:$0xff]  ;;  %s4857_s28 = scalar_lea.vmem %s6289_s11, 2048  ;;  %p6636_p0 = scmp.ne.s32.totalorder %s6494_s13, 0 }
  0x75   : > { %4156 = vmatprep.subr.bf16.mxu0 %v5195_v9  ;;  %6499 = vst [vmem:[#allocation15_spill] sm:$0xff] %v5207_v18  ;;  %v5218_v30 = vpack.c.bf16 %v319_v29, %v316_v28  ;;  %v5222_v37 = vpack.c.bf16 %v325_v34, %v322_v33  ;;  %v5228_v41 = vsub.f32 %v275_v0, %v292_v3  ;;  %p4858_p11 = scmp.ne.s32.totalorder %s6289_s11, %s4857_s28  ;;  %s4966_s27 = smov [#allocation8]  }
  0x76   : > { %v6405_v17 = vand.u32 4294901760, %v5204_v16  ;;  %6500 = vst [vmem:[#allocation16_spill] sm:$0xff] %v5214_v25  ;;  %v5226_v40 = vpack.c.bf16 %v331_v39, %v328_v38  ;;  %v5230_v42 = vsub.f32 %v276_v1, %v295_v4  ;;  %v5232_v43 = vsub.f32 %v277_v2, %v298_v6  ;;  %s4861_s20 = sshll.u32 %s4966_s27, 4  ;;  %s4862_s20 = int_to_ptr.vmem [resolvable:$false] %s4861_s20 }
  0x77   : > { %6501 = vst [vmem:[#allocation17_spill] sm:$0xff] %v5218_v30  ;;  %6502 = vst [vmem:[#allocation18_spill] sm:$0xff] %v5222_v37  ;;  %v5234_v44 = vsub.f32 %v278_v5, %v301_v7  ;;  %v5236_v45 = vsub.f32 %v279_v10, %v304_v14  ;;  %v5238_v46 = vsub.f32 %v280_v11, %v307_v15  ;;  %v334_v1 = vand.u32 4294901760, %v289_v54  ;;  %v261_v5 = vld [vmem:[%s5183_s24 + $0x10] sm:$0xff]  ;;  %v262_v10 = vld [vmem:[%s5183_s24 + $0x18] sm:$0xff]  ;;  %p4859_p2 = pnand %p4858_p11, %p6636_p0  ;;  %s4863_s29 = scalar_lea.vmem %s4862_s20, 4096 }
  0x78   : > { %v375_v21 = vsub.f32 %v5204_v16, %v6405_v17  ;;  %6503 = vst [vmem:[#allocation19_spill] sm:$0xff] %v5226_v40  ;;  %6504 = vst [vmem:[#allocation20_spill] sm:$0xff] %v5228_v41  ;;  %v5240_v47 = vsub.f32 %v281_v19, %v310_v23  ;;  %v5242_v48 = vsub.f32 %v282_v20, %v313_v24  ;;  %v337_v2 = vand.u32 4294901760, %v290_v55  ;;  %v263_v15 = vld [vmem:[%s5183_s24 + $0x20] sm:$0xff]  ;;  %v264_v23 = vld [vmem:[%s5183_s24 + $0x28] sm:$0xff]  ;;  %p4864_p7 = scmp.lt.s32.totalorder %s6289_s11, %s4862_s20  ;;  %p4865_p9 = scmp.lt.s32.totalorder %s4863_s29, %s4857_s28 }
  0x79   : > { %6505 = vst [vmem:[#allocation21_spill] sm:$0xff] %v5230_v42  ;;  %6506 = vst [vmem:[#allocation22_spill] sm:$0xff] %v5232_v43  ;;  %v5244_v49 = vsub.f32 %v283_v26, %v316_v28  ;;  %v5246_v50 = vsub.f32 %v284_v27, %v319_v29  ;;  %v5248_v51 = vsub.f32 %v285_v31, %v322_v33  ;;  %v6404_v3 = vand.u32 4294901760, %v5228_v41  ;;  %v265_v33 = vld [vmem:[%s5183_s24 + $0x30] sm:$0xff]  ;;  %p4860_p3 = pneg %p4859_p2 }
  0x7a   : > { %v376_v22 = vand.u32 4294901760, %v375_v21  ;;  %6507 = vst [vmem:[#allocation23_spill] sm:$0xff] %v5234_v44  ;;  %6508 = vst [vmem:[#allocation24_spill] sm:$0xff] %v5236_v45  ;;  %v5250_v52 = vsub.f32 %v286_v32, %v325_v34  ;;  %v5254_v53 = vpack.c.bf16 %v5230_v42, %v5228_v41  ;;  %v5256_v56 = vsub.f32 %v287_v35, %v328_v38  ;;  %v266_v38 = vld [vmem:[%s5183_s24 + $0x38] sm:$0xff]  ;;  %p4866_p12 = por %p4865_p9, %p4864_p7 }
  0x7b   : > { %6509 = vst [vmem:[#allocation25_spill] sm:$0xff] %v5238_v46  ;;  %6510 = vst [vmem:[#allocation26_spill] sm:$0xff] %v5240_v47  ;;  %v5258_v57 = vsub.f32 %v288_v36, %v331_v39  ;;  %v5262_v58 = vpack.c.bf16 %v5234_v44, %v5232_v43  ;;  %v5266_v59 = vpack.c.bf16 %v5238_v46, %v5236_v45  ;;  %v6402_v4 = vand.u32 4294901760, %v5230_v42 }
  0x7c   : > { %4158 = vmatpush3.bf16.xpose.msra.mxu0 %v5195_v9  ;;  %3511 = vmatprep.mubr.f32.mxu0 %v376_v22  ;;  %6511 = vst [vmem:[#allocation27_spill] sm:$0xff] %v5242_v48  ;;  %v5270_v60 = vpack.c.bf16 %v5242_v48, %v5240_v47  ;;  %v5276_v62 = vpack.c.bf16 %v5246_v50, %v5244_v49  ;;  %v5290_v6 = vand.u32 4294901760, %v260_v61  ;;  %v5292_v7 = vand.u32 4294901760, %v261_v5  ;;  %p4867_p1 = pnand %p4866_p12, %p4860_p3 }
  0x7d   : > { %4160 = vmatprep.subr.bf16.mxu0 %v5207_v18  ;;  %v5280_v63 = vpack.c.bf16 %v5250_v52, %v5248_v51  ;;  %v5284_v0 = vpack.c.bf16 %v5258_v57, %v5256_v56  ;;  %v5295_v11 = vpack.c.bf16 %v337_v2, %v334_v1  ;;  %v536_v12 = vsub.f32 %v5228_v41, %v6404_v3 }
  0x7e   : > { %v543_v14 = vsub.f32 %v5230_v42, %v6402_v4  ;;  %v5304_v19 = vsub.f32 %v289_v54, %v334_v1  ;;  %v5306_v20 = vsub.f32 %v290_v55, %v337_v2  ;;  %v5309_v21 = vsub.f32 %v260_v61, %v5290_v6  ;;  %v267_v61 = vld [vmem:[%s5183_s24 + $0x40] sm:$0xff] }
  0x7f   : > { %6512 = vst [vmem:[#allocation28_spill] sm:$0xff] %v5295_v11  ;;  %v5311_v22 = vand.u32 4294901760, %v262_v10  ;;  %v5316_v24 = vsub.f32 %v261_v5, %v5292_v7  ;;  %v5318_v26 = vand.u32 4294901760, %v263_v15  ;;  %v537_v28 = vand.u32 4294901760, %v536_v12 }
  0x80   : > { %v5322_v27 = vpack.c.bf16 %v5306_v20, %v5304_v19  ;;  %v544_v29 = vand.u32 4294901760, %v543_v14  ;;  %v6401_v31 = vand.u32 4294901760, %v5232_v43  ;;  %v6400_v32 = vand.u32 4294901760, %v5234_v44 }
  0x81   : > { %v5328_v34 = vand.u32 4294901760, %v264_v23  ;;  %v6403_v35 = vand.u32 4294901760, %v5309_v21  ;;  %v5332_v36 = vsub.f32 %v262_v10, %v5311_v22  ;;  %v6407_v39 = vand.u32 4294901760, %v5316_v24 }
  0x82   : > { %v5337_v54 = vsub.f32 %v263_v15, %v5318_v26  ;;  %v5339_v55 = vand.u32 4294901760, %v265_v33  ;;  %v4183_v1 = vpack.c.bf16 %v544_v29, %v537_v28  ;;  %v550_v2 = vsub.f32 %v5232_v43, %v6401_v31  ;;  %v268_v31 = vld [vmem:[%s5183_s24 + $0x48] sm:$0xff]  ;;  %v269_v15 = vld [vmem:[%s5183_s24 + $0x50] sm:$0xff] }
  0x83   : > { %v557_v5 = vsub.f32 %v5234_v44, %v6400_v32  ;;  %v5349_v10 = vsub.f32 %v264_v23, %v5328_v34  ;;  %v5351_v12 = vand.u32 4294901760, %v266_v38  ;;  %v385_v14 = vsub.f32 %v5309_v21, %v6403_v35 }
  0x84   : > { %4162 = vmatpush3.bf16.xpose.msra.mxu0 %v5207_v18  ;;  %v5357_v28 = vand.u32 4294901760, %v267_v61  ;;  %v395_v29 = vsub.f32 %v5316_v24, %v6407_v39  ;;  %v5365_v23 = vsub.f32 %v265_v33, %v5339_v55  ;;  %v551_v4 = vand.u32 4294901760, %v550_v2 }
  0x85   : > { %4164 = vmatprep.subr.bf16.mxu0 %v5214_v25  ;;  %6513 = vst [vmem:[#allocation29_spill] sm:$0xff] %v5349_v10  ;;  %v558_v35 = vand.u32 4294901760, %v557_v5  ;;  %v5373_v39 = vsub.f32 %v266_v38, %v5351_v12  ;;  %v386_v32 = vand.u32 4294901760, %v385_v14  ;;  %v6516_v33 = vand.u32 4294901760, %v5332_v36  ;;  %v270_v38 = vld [vmem:[%s5183_s24 + $0x58] sm:$0xff] }
  0x86   : > { %6514 = vst [vmem:[#allocation30_spill] sm:$0xff] %v5365_v23  ;;  %v5379_v42 = vsub.f32 %v267_v61, %v5357_v28  ;;  %v5381_v2 = vand.u32 4294901760, %v268_v31  ;;  %v396_v5 = vand.u32 4294901760, %v395_v29  ;;  %v6518_v17 = vand.u32 4294901760, %v5337_v54  ;;  %v271_v29 = vld [vmem:[%s5183_s24 + $0x60] sm:$0xff] }
  0x87   : > { %6515 = vst [vmem:[#allocation31_spill] sm:$0xff] %v5373_v39  ;;  %v405_v43 = vsub.f32 %v5332_v36, %v6516_v33  ;;  %v5387_v41 = vand.u32 4294901760, %v269_v15  ;;  %v4187_v14 = vpack.c.bf16 %v558_v35, %v551_v4  ;;  %v6520_v61 = vand.u32 4294901760, %v5238_v46 }
  0x88   : > { %6517 = vst [vmem:[#allocation32_spill] sm:$0xff] %v5379_v42  ;;  %v415_v3 = vsub.f32 %v5337_v54, %v6518_v17  ;;  %v5403_v35 = vsub.f32 %v268_v31, %v5381_v2 }
  0x8c   : > { %4166 = vmatpush3.bf16.xpose.msra.mxu0 %v5214_v25  ;;  %v6523_v25 = vand.u32 4294901760, %v5373_v39 }
  0x8d   : > { %4168 = vmatprep.subr.bf16.mxu0 %v5218_v30 }
  0x94   : > { %4170 = vmatpush3.bf16.xpose.msra.mxu0 %v5218_v30  ;;  %v406_v30 = vand.u32 4294901760, %v405_v43  ;;  %v272_v43 = vld [vmem:[%s5183_s24 + $0x68] sm:$0xff] }
  0x95   : > { %4172 = vmatprep.subr.bf16.mxu0 %v5222_v37 }
  0x9c   : > { %4174 = vmatpush3.bf16.xpose.msra.mxu0 %v5222_v37  ;;  %v6521_v37 = vand.u32 4294901760, %v5349_v10 }
  0x9d   : > { %4176 = vmatprep.subr.bf16.mxu0 %v5226_v40 }
  0x9e   : > { %v425_v17 = vsub.f32 %v5349_v10, %v6521_v37  ;;  %v5411_v37 = vsub.f32 %v269_v15, %v5387_v41  ;;  %v6524_v15 = vand.u32 4294901760, %v5379_v42 }
  0xa0   : > { %v455_v18 = vsub.f32 %v5379_v42, %v6524_v15  ;;  %v6525_v15 = vand.u32 4294901760, %v5240_v47 }
  0xa4   : > { %4178 = vmatpush3.bf16.xpose.msra.mxu0 %v5226_v40  ;;  %v571_v40 = vsub.f32 %v5238_v46, %v6520_v61  ;;  %v416_v61 = vand.u32 4294901760, %v415_v3  ;;  %v6522_v46 = vand.u32 4294901760, %v5365_v23  ;;  %v426_v3 = vand.u32 4294901760, %v425_v17 }
  0xa5   : > { %4180 = vmatprep.subr.bf16.mxu0 %v5295_v11 }
  0xa6   : > { %v572_v44 = vand.u32 4294901760, %v571_v40 }
  0xac   : > { %4182 = vmatpush3.bf16.xpose.msra.mxu0 %v5295_v11  ;;  %v6519_v11 = vand.u32 4294901760, %v5236_v45 }
  0xad   : > { %4184 = vmatprep.subr.bf16.mxu0 %v4183_v1 }
  0xae   : > { %v564_v33 = vsub.f32 %v5236_v45, %v6519_v11  ;;  %v5405_v11 = vand.u32 4294901760, %v270_v38  ;;  %v435_v45 = vsub.f32 %v5365_v23, %v6522_v46  ;;  %v445_v46 = vsub.f32 %v5373_v39, %v6523_v25 }
  0xaf   : > { %v578_v23 = vsub.f32 %v5240_v47, %v6525_v15  ;;  %v6528_v15 = vand.u32 4294901760, %v5411_v37 }
  0xb0   : > { %v565_v4 = vand.u32 4294901760, %v564_v33  ;;  %v5427_v40 = vsub.f32 %v270_v38, %v5405_v11  ;;  %v5429_v33 = vand.u32 4294901760, %v272_v43  ;;  %v6526_v38 = vand.u32 4294901760, %v5242_v48 }
  0xb1   : > { %v446_v10 = vand.u32 4294901760, %v445_v46 }
  0xb2   : > { %v4191_v39 = vpack.c.bf16 %v572_v44, %v565_v4  ;;  %v585_v42 = vsub.f32 %v5242_v48, %v6526_v38  ;;  %v5449_v17 = vsub.f32 %v272_v43, %v5429_v33  ;;  %v456_v4 = vand.u32 4294901760, %v455_v18 }
  0xb3   : > { %3512 = vmatmul.mubr.f32.vlgmr.msra.gmra.mrb[0].mxu0 %v386_v32  ;;  %v5413_v32 = vand.u32 4294901760, %v271_v29  ;;  %v475_v38 = vsub.f32 %v5411_v37, %v6528_v15  ;;  %v6529_v18 = vand.u32 4294901760, %v5427_v40 }
  0xb4   : > { %4186 = vmatpush3.bf16.xpose.msra.mxu0 %v4183_v1  ;;  %3514 = vmatprep.mubr.f32.mxu0 %v396_v5  ;;  %v273_v5 = vld [vmem:[%s5183_s24 + $0x70] sm:$0xff]  ;;  %v436_v1 = vand.u32 4294901760, %v435_v45  ;;  %v6527_v45 = vand.u32 4294901760, %v5403_v35 }
  0xb5   : > { %4188 = vmatprep.subr.bf16.mxu0 %v4187_v14  ;;  %v5433_v31 = vsub.f32 %v271_v29, %v5413_v32  ;;  %v5435_v25 = vand.u32 4294901760, %v273_v5  ;;  %v586_v29 = vand.u32 4294901760, %v585_v42 }
  0xb7   : > { %3515 = vmatmul.mubr.f32.gmra.mrb[2].mxu0 %v406_v30  ;;  %v274_v30 = vld [vmem:[%s5183_s24 + $0x78] sm:$0xff]  ;;  %v5458_v46 = vsub.f32 %v273_v5, %v5435_v25  ;;  %v476_v5 = vand.u32 4294901760, %v475_v38 }
  0xb8   : > { %3517 = vmatprep.mubr.f32.mxu0 %v416_v61  ;;  %v465_v61 = vsub.f32 %v5403_v35, %v6527_v45  ;;  %v5451_v44 = vand.u32 4294901760, %v274_v30  ;;  %v579_v45 = vand.u32 4294901760, %v578_v23  ;;  %v6530_v23 = vand.u32 4294901760, %v5433_v31 }
  0xb9   : > { %v514_v43 = vand.u32 4294901760, %v5458_v46 }
  0xba   : > { %v495_v42 = vsub.f32 %v5433_v31, %v6530_v23  ;;  %v4195_v48 = vpack.c.bf16 %v586_v29, %v579_v45 }
  0xbb   : > { %3518 = vmatmul.mubr.f32.gmra.mrb[4].mxu0 %v426_v3  ;;  %v5467_v3 = vsub.f32 %v274_v30, %v5451_v44  ;;  %v515_v29 = vsub.f32 %v5458_v46, %v514_v43 }
  0xbc   : > { %4190 = vmatpush3.bf16.xpose.msra.mxu0 %v4187_v14  ;;  %3520 = vmatprep.mubr.f32.mxu0 %v436_v1  ;;  %v466_v14 = vand.u32 4294901760, %v465_v61  ;;  %v485_v1 = vsub.f32 %v5427_v40, %v6529_v18  ;;  %v6532_v18 = vand.u32 4294901760, %v5246_v50  ;;  %v496_v23 = vand.u32 4294901760, %v495_v42 }
  0xbd   : > { %4192 = vmatprep.subr.bf16.mxu0 %v4191_v39  ;;  %v6435_v47 = vand.u32 4294901760, %v5467_v3 }
  0xbe   : > { %v599_v15 = vsub.f32 %v5246_v50, %v6532_v18  ;;  %v486_v30 = vand.u32 4294901760, %v485_v1  ;;  %v605_v18 = vand.u32 4294901760, %v5248_v51 }
  0xbf   : > { %3521 = vmatmul.mubr.f32.gmra.mrb[6].mxu0 %v446_v10  ;;  %v6531_v10 = vand.u32 4294901760, %v5244_v49 }
  0xc0   : > { %3523 = vmatprep.mubr.f32.mxu0 %v456_v4  ;;  %v6533_v4 = vand.u32 4294901760, %v5449_v17  ;;  %v606_v42 = vsub.f32 %v5248_v51, %v605_v18  ;;  %v5660_v51 = vld [vmem:[#allocation7 + $0x28] sm:$0xff] }
  0xc1   : > { %v592_v61 = vsub.f32 %v5244_v49, %v6531_v10  ;;  %v600_v10 = vand.u32 4294901760, %v599_v15 }
  0xc2   : > { %v505_v38 = vsub.f32 %v5449_v17, %v6533_v4  ;;  %v525_v4 = vsub.f32 %v5467_v3, %v6435_v47  ;;  %v619_v47 = vand.u32 4294901760, %v5256_v56 }
  0xc3   : > { %3524 = vmatmul.mubr.f32.gmra.mrb[8].mxu0 %v466_v14  ;;  %v593_v45 = vand.u32 4294901760, %v592_v61  ;;  %v612_v14 = vand.u32 4294901760, %v5250_v52 }
  0xc4   : > { %4194 = vmatpush3.bf16.xpose.msra.mxu0 %v4191_v39  ;;  %3526 = vmatprep.mubr.f32.mxu0 %v476_v5  ;;  %v506_v1 = vand.u32 4294901760, %v505_v38  ;;  %v516_v39 = vand.u32 4294901760, %v515_v29  ;;  %v526_v61 = vand.u32 4294901760, %v525_v4  ;;  %v6437_v4 = vand.u32 4294901760, %v5304_v19 }
  0xc5   : > { %4196 = vmatprep.subr.bf16.mxu0 %v4195_v48  ;;  %v4199_v5 = vpack.c.bf16 %v600_v10, %v593_v45  ;;  %v613_v15 = vsub.f32 %v5250_v52, %v612_v14  ;;  %v620_v45 = vsub.f32 %v5256_v56, %v619_v47 }
  0xc7   : > { %3527 = vmatmul.mubr.f32.gmra.mrb[10].mxu0 %v486_v30  ;;  %v607_v30 = vand.u32 4294901760, %v606_v42  ;;  %v614_v38 = vand.u32 4294901760, %v613_v15  ;;  %v621_v10 = vand.u32 4294901760, %v620_v45  ;;  %v634_v15 = vsub.f32 %v5304_v19, %v6437_v4  ;;  %v6543_v45 = vld [vmem:[#allocation19_spill] sm:$0xff] }
  0xc8   : > { %3529 = vmatprep.mubr.f32.mxu0 %v496_v23  ;;  %v6438_v23 = vand.u32 4294901760, %v5258_v57  ;;  %v6554_v4 = vand.u32 4294901760, %v5316_v24 }
  0xc9   : > { %v4203_v29 = vpack.c.bf16 %v614_v38, %v607_v30  ;;  %v635_v30 = vand.u32 4294901760, %v634_v15 }
  0xcb   : > { %3530 = vmatmul.mubr.f32.gmra.mrb[12].mxu0 %v506_v1 }
  0xcc   : > { %4198 = vmatpush3.bf16.xpose.msra.mxu0 %v4195_v48  ;;  %3532 = vmatprep.mubr.f32.mxu0 %v516_v39  ;;  %v627_v48 = vsub.f32 %v5258_v57, %v6438_v23  ;;  %v6436_v39 = vand.u32 4294901760, %v5306_v20 }
  0xcd   : > { %4200 = vmatprep.subr.bf16.mxu0 %v4199_v5 }
  0xce   : > { %v628_v1 = vand.u32 4294901760, %v627_v48  ;;  %v6544_v48 = vld [vmem:[#allocation28_spill] sm:$0xff] }
  0xcf   : > { %3533 = vmatmul.mubr.f32.gmra.mrb[14].mxu0 %v526_v61  ;;  %v641_v61 = vsub.f32 %v5306_v20, %v6436_v39  ;;  %v6553_v39 = vand.u32 4294901760, %v5309_v21 }
  0xd0   : > { %3567 = vmatprep.mubr.f32.mxu0 %v5200_v13  ;;  %v4207_v42 = vpack.c.bf16 %v628_v1, %v621_v10  ;;  %v6545_v10 = vld [vmem:[#allocation20_spill] sm:$0xff] }
  0xd1   : > { %v6546_v1 = vand.u32 4294901760, %v6545_v10  ;;  %v6555_v10 = vand.u32 4294901760, %v5332_v36 }
  0xd4   : > { %4202 = vmatpush3.bf16.xpose.msra.mxu0 %v4199_v5  ;;  %v642_v5 = vand.u32 4294901760, %v641_v61 }
  0xd5   : > { %4204 = vmatprep.subr.bf16.mxu0 %v4203_v29 }
  0xd6   : > { %v4211_v38 = vpack.c.bf16 %v642_v5, %v635_v30  ;;  %v6551_v5 = vld [vmem:[#allocation23_spill] sm:$0xff] }
  0xdc   : > { %4206 = vmatpush3.bf16.xpose.msra.mxu0 %v4203_v29  ;;  %v6542_v29 = vld [vmem:[#allocation18_spill] sm:$0xff] }
  0xdd   : > { %4208 = vmatprep.subr.bf16.mxu0 %v4207_v42 }
  0xe4   : > { %4210 = vmatpush3.bf16.xpose.msra.mxu0 %v4207_v42  ;;  %v6547_v42 = vld [vmem:[#allocation21_spill] sm:$0xff] }
  0xe5   : > { %4212 = vmatprep.subr.bf16.mxu0 %v4211_v38  ;;  %v6548_v15 = vand.u32 4294901760, %v6547_v42  ;;  %v6557_v42 = vld [vmem:[#allocation24_spill] sm:$0xff] }
  0xe7   : > { %v4279_v61 = vpack.c.bf16 %v6548_v15, %v6546_v1  ;;  %v6556_v1 = vand.u32 4294901760, %v5337_v54  ;;  %v6558_v15 = vand.u32 4294901760, %v6557_v42 }
  0xec   : > { %4214 = vmatpush3.bf16.xpose.msra.mxu0 %v4211_v38  ;;  %v6552_v38 = vand.u32 4294901760, %v6551_v5 }
  0xed   : > { %4216 = vmatprep.subr.bf16.mxu0 %v5254_v53 }
  0xf3   : > { %3568 = vmatmul.mubr.f32.vlgmr.msra.gmra.mrb[0].mxu0 %v5290_v6 }
  0xf4   : > { %4218 = vmatpush3.bf16.xpose.msra.mxu0 %v5254_v53  ;;  %3570 = vmatprep.mubr.f32.mxu0 %v5292_v7  ;;  %v6534_v53 = vld [vmem:[#allocation29_spill] sm:$0xff] }
  0xf5   : > { %4220 = vmatprep.subr.bf16.mxu0 %v5262_v58 }
  0xf7   : > { %3571 = vmatmul.mubr.f32.gmra.mrb[2].mxu0 %v5311_v22 }
  0xf8   : > { %3573 = vmatprep.mubr.f32.mxu0 %v5318_v26 }
  0xfb   : > { %3574 = vmatmul.mubr.f32.gmra.mrb[4].mxu0 %v5328_v34 }
  0xfc   : > { %4222 = vmatpush3.bf16.xpose.msra.mxu0 %v5262_v58  ;;  %3576 = vmatprep.mubr.f32.mxu0 %v5339_v55  ;;  %v6535_v58 = vld [vmem:[#allocation30_spill] sm:$0xff] }
  0xfd   : > { %4224 = vmatprep.subr.bf16.mxu0 %v5266_v59 }
  0xff   : > { %3577 = vmatmul.mubr.f32.gmra.mrb[6].mxu0 %v5351_v12 }
 0x100   : > { %3579 = vmatprep.mubr.f32.mxu0 %v5357_v28 }
 0x103   : > { %3580 = vmatmul.mubr.f32.gmra.mrb[8].mxu0 %v5381_v2 }
 0x104   : > { %4226 = vmatpush3.bf16.xpose.msra.mxu0 %v5266_v59  ;;  %3582 = vmatprep.mubr.f32.mxu0 %v5387_v41  ;;  %v6536_v59 = vld [vmem:[#allocation15_spill] sm:$0xff] }
 0x105   : > { %4228 = vmatprep.subr.bf16.mxu0 %v5270_v60 }
 0x107   : > { %3583 = vmatmul.mubr.f32.gmra.mrb[10].mxu0 %v5405_v11 }
 0x108   : > { %3585 = vmatprep.mubr.f32.mxu0 %v5413_v32 }
 0x10b   : > { %3586 = vmatmul.mubr.f32.gmra.mrb[12].mxu0 %v5429_v33 }
 0x10c   : > { %4230 = vmatpush3.bf16.xpose.msra.mxu0 %v5270_v60  ;;  %3588 = vmatprep.mubr.f32.mxu0 %v5435_v25  ;;  %v6537_v60 = vld [vmem:[#allocation31_spill] sm:$0xff] }
 0x10d   : > { %4232 = vmatprep.subr.bf16.mxu0 %v5276_v62 }
 0x10f   : > { %3589 = vmatmul.mubr.f32.gmra.mrb[14].mxu0 %v5451_v44 }
 0x110   : > { %3623 = vmatprep.mubr.f32.mxu0 %v5204_v16 }
 0x114   : > { %4234 = vmatpush3.bf16.xpose.msra.mxu0 %v5276_v62  ;;  %v6538_v62 = vld [vmem:[#allocation32_spill] sm:$0xff] }
 0x115   : > { %4236 = vmatprep.subr.bf16.mxu0 %v5280_v63 }
 0x11c   : > { %4238 = vmatpush3.bf16.xpose.msra.mxu0 %v5280_v63  ;;  %v6539_v63 = vld [vmem:[#allocation16_spill] sm:$0xff] }
 0x11d   : > { %4240 = vmatprep.subr.bf16.mxu0 %v5284_v0 }
 0x124   : > { %4242 = vmatpush3.bf16.xpose.msra.mxu0 %v5284_v0  ;;  %v6540_v0 = vld [vmem:[#allocation17_spill] sm:$0xff] }
 0x125   : > { %4244 = vmatprep.subr.bf16.mxu0 %v5322_v27 }
 0x12c   : > { %4246 = vmatpush3.bf16.xpose.msra.mxu0 %v5322_v27  ;;  %v6541_v27 = vand.u32 4294901760, %v5204_v16  ;;  %v6549_v16 = vld [vmem:[#allocation22_spill] sm:$0xff] }
 0x12d   : > { %4248 = vmatprep.subr.bf16.mxu0 %v5193_v8  ;;  %v6550_v30 = vand.u32 4294901760, %v6549_v16  ;;  %v6559_v16 = vld [vmem:[#allocation25_spill] sm:$0xff] }
 0x12e   : > { %v6560_v23 = vand.u32 4294901760, %v6559_v16  ;;  %v5658_v16 = vld [vmem:[#allocation7 + $0x20] sm:$0xff] }
 0x12f   : > { %v1606_v52 = vand.u32 4294901760, %v5658_v16 }
 0x130   : > { %v4287_v5 = vpack.c.bf16 %v6560_v23, %v6558_v15  ;;  %v6569_v23 = vand.u32 4294901760, %v5403_v35 }
 0x133   : > { %3624 = vmatmul.mubr.f32.vlgmr.msra.gmra.mrb[0].mxu0 %v5309_v21  ;;  %v6562_v21 = vand.u32 4294901760, %v6535_v58 }
 0x134   : > { %4250 = vmatpush3.bf16.xpose.msra.mxu0 %v5193_v8  ;;  %3626 = vmatprep.mubr.f32.mxu0 %v5316_v24  ;;  %v6563_v24 = vand.u32 4294901760, %v6537_v60 }
 0x135   : > { %4252 = vmatprep.subr.bf16.mxu0 %v5195_v9 }
 0x137   : > { %3627 = vmatmul.mubr.f32.gmra.mrb[2].mxu0 %v5332_v36  ;;  %v6564_v36 = vand.u32 4294901760, %v6538_v62 }
 0x138   : > { %3629 = vmatprep.mubr.f32.mxu0 %v5337_v54  ;;  %v6565_v54 = vld [vmem:[#allocation26_spill] sm:$0xff] }
 0x13b   : > { %3630 = vmatmul.mubr.f32.gmra.mrb[4].mxu0 %v6534_v53 }
 0x13c   : > { %4254 = vmatpush3.bf16.xpose.msra.mxu0 %v5195_v9  ;;  %3632 = vmatprep.mubr.f32.mxu0 %v6535_v58  ;;  %v6571_v58 = vand.u32 4294901760, %v5427_v40 }
 0x13d   : > { %4256 = vmatprep.subr.bf16.mxu0 %v6536_v59 }
 0x13f   : > { %3633 = vmatmul.mubr.f32.gmra.mrb[6].mxu0 %v6537_v60  ;;  %v6572_v60 = vand.u32 4294901760, %v5433_v31 }
 0x140   : > { %3635 = vmatprep.mubr.f32.mxu0 %v6538_v62  ;;  %v6573_v62 = vand.u32 4294901760, %v5244_v49 }
 0x143   : > { %3636 = vmatmul.mubr.f32.gmra.mrb[8].mxu0 %v5403_v35  ;;  %v6576_v35 = vand.u32 4294901760, %v5467_v3 }
 0x144   : > { %4258 = vmatpush3.bf16.xpose.msra.mxu0 %v6536_v59  ;;  %3638 = vmatprep.mubr.f32.mxu0 %v5411_v37 }
 0x145   : > { %4260 = vmatprep.subr.bf16.mxu0 %v6539_v63 }
 0x147   : > { %3639 = vmatmul.mubr.f32.gmra.mrb[10].mxu0 %v5427_v40  ;;  %v5633_v40 = vld [vmem:[#allocation7 + $0x10] sm:$0xff] }
 0x148   : > { %3641 = vmatprep.mubr.f32.mxu0 %v5433_v31  ;;  %v5631_v31 = vld [vmem:[#allocation7 + $0x8] sm:$0xff] }
 0x14b   : > { %3642 = vmatmul.mubr.f32.gmra.mrb[12].mxu0 %v5449_v17 }
 0x14c   : > { %4262 = vmatpush3.bf16.xpose.msra.mxu0 %v6539_v63  ;;  %3644 = vmatprep.mubr.f32.mxu0 %v5458_v46  ;;  %v1600_v46 = vand.u32 4294901760, %v5633_v40 }
 0x14d   : > { %4264 = vmatprep.subr.bf16.mxu0 %v6540_v0 }
 0x14f   : > { %3645 = vmatmul.mubr.f32.gmra.mrb[14].mxu0 %v5467_v3  ;;  %v4299_v3 = vpack.c.bf16 %v612_v14, %v605_v18  ;;  %v1609_v18 = vand.u32 4294901760, %v5660_v51  ;;  %v6577_v14 = vand.u32 4294901760, %v5258_v57  ;;  %v6578_v57 = vand.u32 4294901760, %v5304_v19 }
 0x150   : > { %3679 = vmatprep.mubr.f32.mxu0 %v6541_v27  ;;  %v4283_v27 = vpack.c.bf16 %v6552_v38, %v6550_v30  ;;  %v6561_v30 = vand.u32 4294901760, %v6534_v53  ;;  %v6570_v53 = vand.u32 4294901760, %v5411_v37  ;;  %v5629_v37 = vld [vmem:[#allocation7] sm:$0xff] }
 0x151   : > { %v1594_v49 = vand.u32 4294901760, %v5629_v37 }
 0x154   : > { %4266 = vmatpush3.bf16.xpose.msra.mxu0 %v6540_v0 }
 0x155   : > { %4268 = vmatprep.subr.bf16.mxu0 %v6542_v29 }
 0x15c   : > { %4270 = vmatpush3.bf16.xpose.msra.mxu0 %v6542_v29 }
 0x15d   : > { %4272 = vmatprep.subr.bf16.mxu0 %v6543_v45 }
 0x164   : > { %4274 = vmatpush3.bf16.xpose.msra.mxu0 %v6543_v45 }
 0x165   : > { %4276 = vmatprep.subr.bf16.mxu0 %v6544_v48 }
 0x16c   : > { %4278 = vmatpush3.bf16.xpose.msra.mxu0 %v6544_v48 }
 0x16d   : > { %4280 = vmatprep.subr.bf16.mxu0 %v4279_v61 }
 0x173   : > { %3680 = vmatmul.mubr.f32.vlgmr.msra.gmra.mrb[0].mxu0 %v6553_v39  ;;  %v6567_v39 = vld [vmem:[#allocation27_spill] sm:$0xff] }
 0x174   : > { %4282 = vmatpush3.bf16.xpose.msra.mxu0 %v4279_v61  ;;  %3682 = vmatprep.mubr.f32.mxu0 %v6554_v4  ;;  %v6566_v4 = vand.u32 4294901760, %v6565_v54  ;;  %v6568_v61 = vand.u32 4294901760, %v6567_v39  ;;  %v5695_v39 = vld [vmem:[#allocation7 + $0x40] sm:$0xff] }
 0x175   : > { %4284 = vmatprep.subr.bf16.mxu0 %v4283_v27  ;;  %v1618_v19 = vand.u32 4294901760, %v5695_v39 }
 0x176   : > { %v4291_v38 = vpack.c.bf16 %v6568_v61, %v6566_v4  ;;  %v5697_v61 = vld [vmem:[#allocation7 + $0x48] sm:$0xff] }
 0x177   : > { %3683 = vmatmul.mubr.f32.gmra.mrb[2].mxu0 %v6555_v10 }
 0x178   : > { %3685 = vmatprep.mubr.f32.mxu0 %v6556_v1  ;;  %v6575_v1 = vand.u32 4294901760, %v5449_v17  ;;  %v5638_v17 = vld [vmem:[#allocation7 + $0x18] sm:$0xff] }
 0x17b   : > { %3686 = vmatmul.mubr.f32.gmra.mrb[4].mxu0 %v6561_v30  ;;  %v5675_v30 = vpack.c.bf16 %v1609_v18, %v1606_v52 }
 0x17c   : > { %4286 = vmatpush3.bf16.xpose.msra.mxu0 %v4283_v27  ;;  %3688 = vmatprep.mubr.f32.mxu0 %v6562_v21  ;;  %v6574_v27 = vand.u32 4294901760, %v5246_v50  ;;  %v1597_v50 = vand.u32 4294901760, %v5631_v31  ;;  %v5677_v21 = vld [vmem:[#allocation7 + $0x30] sm:$0xff] }
 0x17d   : > { %4288 = vmatprep.subr.bf16.mxu0 %v4287_v5  ;;  %v1612_v56 = vand.u32 4294901760, %v5677_v21 }
 0x17e   : > { %v4295_v10 = vpack.c.bf16 %v6574_v27, %v6573_v62  ;;  %v5650_v42 = vpack.c.bf16 %v1597_v50, %v1594_v49  ;;  %v5725_v27 = vld [vmem:[#allocation7 + $0x60] sm:$0xff] }
 0x17f   : > { %3689 = vmatmul.mubr.f32.gmra.mrb[6].mxu0 %v6563_v24  ;;  %v5679_v24 = vld [vmem:[#allocation7 + $0x38] sm:$0xff] }
 0x180   : > { %3691 = vmatprep.mubr.f32.mxu0 %v6564_v36  ;;  %4344 = vmatprep.subr.bf16.mxu1 %v5650_v42  ;;  %v6579_v36 = vand.u32 4294901760, %v5306_v20  ;;  %v1621_v20 = vand.u32 4294901760, %v5697_v61 }
 0x181   : > { %4346 = vmatpush3.bf16.xpose.msra.mxu1 %v5650_v42 }
 0x182   : > { %v4307_v54 = vpack.c.bf16 %v6579_v36, %v6578_v57 }
 0x183   : > { %3692 = vmatmul.mubr.f32.gmra.mrb[8].mxu0 %v6569_v23  ;;  %v5709_v23 = vld [vmem:[#allocation7 + $0x50] sm:$0xff] }
 0x184   : > { %4290 = vmatpush3.bf16.xpose.msra.mxu0 %v4287_v5  ;;  %3694 = vmatprep.mubr.f32.mxu0 %v6570_v53  ;;  %v4303_v5 = vpack.c.bf16 %v6577_v14, %v619_v47  ;;  %v1615_v47 = vand.u32 4294901760, %v5679_v24  ;;  %v5711_v53 = vld [vmem:[#allocation7 + $0x58] sm:$0xff] }
 0x185   : > { %4292 = vmatprep.subr.bf16.mxu0 %v4291_v38 }
 0x186   : > { %v5693_v4 = vpack.c.bf16 %v1615_v47, %v1612_v56 }
 0x187   : > { %3695 = vmatmul.mubr.f32.gmra.mrb[10].mxu0 %v6571_v58  ;;  %v6458_v58 = vand.u32 4294901760, %v5709_v23 }
 0x188   : > { %3697 = vmatprep.mubr.f32.mxu0 %v6572_v60  ;;  %6580 = vst [vmem:[#allocation29_spill] sm:$0xff] %v5693_v4  ;;  %v6457_v60 = vand.u32 4294901760, %v5711_v53 }
 0x18a   : > { %v5722_v62 = vpack.c.bf16 %v6457_v60, %v6458_v58 }
 0x18b   : > { %3698 = vmatmul.mubr.f32.gmra.mrb[12].mxu0 %v6575_v1  ;;  %v6456_v1 = vand.u32 4294901760, %v5725_v27 }
 0x18c   : > { %4294 = vmatpush3.bf16.xpose.msra.mxu0 %v4291_v38  ;;  %3700 = vmatprep.mubr.f32.mxu0 %v514_v43  ;;  %v1603_v43 = vand.u32 4294901760, %v5638_v17  ;;  %v5707_v38 = vpack.c.bf16 %v1621_v20, %v1618_v19  ;;  %6582 = vst [vmem:[#allocation15_spill] sm:$0xff] %v5722_v62 }
 0x18d   : > { %4296 = vmatprep.subr.bf16.mxu0 %v4295_v10 }
 0x18e   : > { %v5656_v15 = vpack.c.bf16 %v1603_v43, %v1600_v46  ;;  %6581 = vst [vmem:[#allocation30_spill] sm:$0xff] %v5707_v38 }
 0x18f   : > { %3701 = vmatmul.mubr.f32.gmra.mrb[14].mxu0 %v6576_v35 }
 0x190   : > { %3735 = vmatprep.mubr.f32.mxu0 %v5200_v13  ;;  %4348 = vmatprep.subr.bf16.mxu1 %v5656_v15 }
 0x191   : > { %4350 = vmatpush3.bf16.xpose.msra.mxu1 %v5656_v15 }
 0x192   : > { %4352 = vmatprep.subr.bf16.mxu1 %v5675_v30 }
 0x194   : > { %4298 = vmatpush3.bf16.xpose.msra.mxu0 %v4295_v10  ;;  %v5727_v10 = vld [vmem:[#allocation7 + $0x68] sm:$0xff] }
 0x195   : > { %4300 = vmatprep.subr.bf16.mxu0 %v4299_v3  ;;  %v6454_v35 = vand.u32 4294901760, %v5727_v10 }
 0x199   : > { %4354 = vmatpush3.bf16.xpose.msra.mxu1 %v5675_v30 }
 0x19a   : > { %4356 = vmatprep.subr.bf16.mxu1 %v5693_v4 }
 0x19c   : > { %4302 = vmatpush3.bf16.xpose.msra.mxu0 %v4299_v3 }
 0x19d   : > { %4304 = vmatprep.subr.bf16.mxu0 %v4303_v5 }
 0x1a1   : > { %4358 = vmatpush3.bf16.xpose.msra.mxu1 %v5693_v4 }
 0x1a2   : > { %4360 = vmatprep.subr.bf16.mxu1 %v5707_v38 }
 0x1a4   : > { %4306 = vmatpush3.bf16.xpose.msra.mxu0 %v4303_v5 }
 0x1a5   : > { %4308 = vmatprep.subr.bf16.mxu0 %v4307_v54 }
 0x1a9   : > { %4362 = vmatpush3.bf16.xpose.msra.mxu1 %v5707_v38 }
 0x1aa   : > { %4364 = vmatprep.subr.bf16.mxu1 %v5722_v62 }
 0x1ac   : > { %4310 = vmatpush3.bf16.xpose.msra.mxu0 %v4307_v54 }
 0x1ad   : > { %4312 = vmatprep.subr.bf16.mxu0 %v5193_v8 }
 0x1b1   : > { %4366 = vmatpush3.bf16.xpose.msra.mxu1 %v5722_v62 }
 0x1b3   : > { %3736 = vmatmul.mubr.f32.vlgmr.msra.gmra.mrb[0].mxu0 %v5290_v6 }
 0x1b4   : > { %4314 = vmatpush3.bf16.xpose.msra.mxu0 %v5193_v8  ;;  %3738 = vmatprep.mubr.f32.mxu0 %v5292_v7  ;;  %v5742_v8 = vpack.c.bf16 %v6454_v35, %v6456_v1 }
 0x1b5   : > { %4316 = vmatprep.subr.bf16.mxu0 %v5195_v9 }
 0x1b6   : > { %6583 = vst [vmem:[#allocation31_spill] sm:$0xff] %v5742_v8  ;;  %4368 = vmatprep.subr.bf16.mxu1 %v5742_v8 }
 0x1b7   : > { %3739 = vmatmul.mubr.f32.gmra.mrb[2].mxu0 %v5311_v22 }
 0x1b8   : > { %3741 = vmatprep.mubr.f32.mxu0 %v5318_v26 }
 0x1b9   : > { %4370 = vmatpush3.bf16.xpose.msra.mxu1 %v5742_v8 }
 0x1bb   : > { %3742 = vmatmul.mubr.f32.gmra.mrb[4].mxu0 %v5328_v34 }
 0x1bc   : > { %4318 = vmatpush3.bf16.xpose.msra.mxu0 %v5195_v9  ;;  %3744 = vmatprep.mubr.f32.mxu0 %v5339_v55  ;;  %v1591_v9 = vld [vmem:[#allocation7 + $0x70] sm:$0xff] }
 0x1bd   : > { %4320 = vmatprep.subr.bf16.mxu0 %v6536_v59 }
 0x1bf   : > { %3745 = vmatmul.mubr.f32.gmra.mrb[6].mxu0 %v5351_v12 }
 0x1c0   : > { %3747 = vmatprep.mubr.f32.mxu0 %v5357_v28 }
 0x1c3   : > { %3748 = vmatmul.mubr.f32.gmra.mrb[8].mxu0 %v5381_v2 }
 0x1c4   : > { %4322 = vmatpush3.bf16.xpose.msra.mxu0 %v6536_v59  ;;  %3750 = vmatprep.mubr.f32.mxu0 %v5387_v41  ;;  %v5824_v59 = vsub.f32 %v5638_v17, %v1603_v43 }
 0x1c5   : > { %4324 = vmatprep.subr.bf16.mxu0 %v6539_v63 }
 0x1c7   : > { %3751 = vmatmul.mubr.f32.gmra.mrb[10].mxu0 %v5405_v11 }
 0x1c8   : > { %3753 = vmatprep.mubr.f32.mxu0 %v5413_v32 }
 0x1cb   : > { %3754 = vmatmul.mubr.f32.gmra.mrb[12].mxu0 %v5429_v33 }
 0x1cc   : > { %4326 = vmatpush3.bf16.xpose.msra.mxu0 %v6539_v63  ;;  %3756 = vmatprep.mubr.f32.mxu0 %v5435_v25 }
 0x1cd   : > { %4328 = vmatprep.subr.bf16.mxu0 %v6540_v0 }
 0x1cf   : > { %3757 = vmatmul.mubr.f32.gmra.mrb[14].mxu0 %v5451_v44 }
 0x1d0   : > { %3791 = vmatprep.mubr.f32.mxu0 %v5200_v13  ;;  %v1592_v13 = vld [vmem:[#allocation7 + $0x78] sm:$0xff] }
 0x1d4   : > { %4330 = vmatpush3.bf16.xpose.msra.mxu0 %v6540_v0  ;;  %v6443_v0 = vand.u32 4294901760, %v5824_v59 }
 0x1d5   : > { %4332 = vmatprep.subr.bf16.mxu0 %v6542_v29 }
 0x1dc   : > { %4334 = vmatpush3.bf16.xpose.msra.mxu0 %v6542_v29 }
 0x1dd   : > { %4336 = vmatprep.subr.bf16.mxu0 %v6543_v45 }
 0x1e4   : > { %4338 = vmatpush3.bf16.xpose.msra.mxu0 %v6543_v45 }
 0x1e5   : > { %4340 = vmatprep.subr.bf16.mxu0 %v6544_v48 }
 0x1ec   : > { %4342 = vmatpush3.bf16.xpose.msra.mxu0 %v6544_v48  ;;  %v1859_v48 = vsub.f32 %v5824_v59, %v6443_v0 }
 0x1ee   : > { %v1860_v14 = vand.u32 4294901760, %v1859_v48 }
 0x1f3   : > { %3792 = vmatmul.mubr.f32.vlgmr.msra.gmra.mrb[0].mxu0 %v5290_v6  ;;  %v1636_v6 = vand.u32 4294901760, %v1591_v9 }
 0x1f4   : > { %3794 = vmatprep.mubr.f32.mxu0 %v5292_v7  ;;  %v1639_v7 = vand.u32 4294901760, %v1592_v13 }
 0x1f7   : > { %3795 = vmatmul.mubr.f32.gmra.mrb[2].mxu0 %v5311_v22  ;;  %v5787_v22 = vpack.c.bf16 %v1639_v7, %v1636_v6 }
 0x1f8   : > { %3797 = vmatprep.mubr.f32.mxu0 %v5318_v26  ;;  %v5797_v26 = vsub.f32 %v5631_v31, %v1597_v50 }
 0x1f9   : > { %6584 = vst [vmem:[#allocation32_spill] sm:$0xff] %v5787_v22  ;;  %4372 = vmatprep.subr.bf16.mxu1 %v5787_v22 }
 0x1fa   : > { %4374 = vmatpush3.bf16.xpose.msra.mxu1 %v5787_v22 }
 0x1fb   : > { %3798 = vmatmul.mubr.f32.gmra.mrb[4].mxu0 %v5328_v34 }
 0x1fc   : > { %3800 = vmatprep.mubr.f32.mxu0 %v5339_v55  ;;  %v6447_v55 = vand.u32 4294901760, %v5797_v26 }
 0x1ff   : > { %3801 = vmatmul.mubr.f32.gmra.mrb[6].mxu0 %v5351_v12 }
 0x200   : > { %3803 = vmatprep.mubr.f32.mxu0 %v5357_v28  ;;  %v1845_v28 = vsub.f32 %v5797_v26, %v6447_v55 }
 0x203   : > { %3804 = vmatmul.mubr.f32.gmra.mrb[8].mxu0 %v5381_v2 }
 0x204   : > { %3806 = vmatprep.mubr.f32.mxu0 %v5387_v41  ;;  %v5792_v41 = vsub.f32 %v5629_v37, %v1594_v49  ;;  %v5848_v49 = vsub.f32 %v5660_v51, %v1609_v18 }
 0x206   : > { %v6449_v34 = vand.u32 4294901760, %v5792_v41  ;;  %v6439_v5 = vand.u32 4294901760, %v5848_v49 }
 0x207   : > { %3807 = vmatmul.mubr.f32.gmra.mrb[10].mxu0 %v5405_v11  ;;  %v1846_v11 = vand.u32 4294901760, %v1845_v28 }
 0x208   : > { %3809 = vmatprep.mubr.f32.mxu0 %v5413_v32  ;;  %v1838_v12 = vsub.f32 %v5792_v41, %v6449_v34 }
 0x20a   : > { %v1839_v2 = vand.u32 4294901760, %v1838_v12 }
 0x20b   : > { %3810 = vmatmul.mubr.f32.gmra.mrb[12].mxu0 %v5429_v33  ;;  %v5812_v33 = vsub.f32 %v1591_v9, %v1636_v6 }
 0x20c   : > { %3812 = vmatprep.mubr.f32.mxu0 %v5435_v25  ;;  %v5809_v32 = vpack.c.bf16 %v1846_v11, %v1839_v2  ;;  %v5814_v25 = vsub.f32 %v1592_v13, %v1639_v7 }
 0x20e   : > { %4376 = vmatprep.subr.bf16.mxu1 %v5809_v32 }
 0x20f   : > { %3813 = vmatmul.mubr.f32.gmra.mrb[14].mxu0 %v5451_v44  ;;  %v5819_v44 = vsub.f32 %v5633_v40, %v1600_v46  ;;  %v5843_v40 = vsub.f32 %v5658_v16, %v1606_v52 }
 0x211   : > { %v6445_v63 = vand.u32 4294901760, %v5819_v44  ;;  %v6440_v18 = vand.u32 4294901760, %v5843_v40 }
 0x213   : > { %v1852_v45 = vsub.f32 %v5819_v44, %v6445_v63 }
 0x215   : > { %v1853_v43 = vand.u32 4294901760, %v1852_v45  ;;  %v1873_v45 = vsub.f32 %v5848_v49, %v6439_v5 }
 0x217   : > { %v5881_v12 = vpack.c.bf16 %v1860_v14, %v1853_v43  ;;  %v5900_v43 = vsub.f32 %v5677_v21, %v1612_v56  ;;  %v1874_v0 = vand.u32 4294901760, %v1873_v45 }
 0x2c6   : > { %v3793_v29 = vpop.f32.mrb[0].mxu0 }
 0x2c7   : > { %v5834_v37 = vand.u32 4294901760, %v3793_v29  ;;  %2880 = vst [vmem:[%s5837_s21 + $0x8] sm:$0xff] %v3793_v29  ;;  %v1483_v31 = vpop.f32.mrb[1].mxu0 }
 0x2c8   : > { %v5850_v50 = vand.u32 4294901760, %v1483_v31  ;;  %2879 = vst [vmem:[%s5837_s21] sm:$0xff] %v1483_v31 }
 0x2c9   : > { %v5854_v17 = vsub.f32 %v3793_v29, %v5834_v37  ;;  %v1866_v29 = vsub.f32 %v5843_v40, %v6440_v18 }
 0x2ca   : > { %v5857_v46 = vsub.f32 %v1483_v31, %v5850_v50  ;;  %v3796_v3 = vpop.f32.mrb[2].mxu0 }
 0x2cb   : > { %v5859_v16 = vand.u32 4294901760, %v3796_v3  ;;  %2882 = vst [vmem:[%s5837_s21 + $0x18] sm:$0xff] %v3796_v3  ;;  %v1495_v52 = vpop.f32.mrb[3].mxu0  ;;  %v6441_v51 = vand.u32 4294901760, %v5854_v17 }
 0x2cc   : > { %v5865_v57 = vand.u32 4294901760, %v1495_v52  ;;  %2881 = vst [vmem:[%s5837_s21 + $0x10] sm:$0xff] %v1495_v52  ;;  %v6451_v36 = vand.u32 4294901760, %v5857_v46 }
 0x2cd   : > { %v5870_v54 = vsub.f32 %v3796_v3, %v5859_v16  ;;  %v1687_v9 = vsub.f32 %v5854_v17, %v6441_v51 }
 0x2ce   : > { %v5876_v13 = vsub.f32 %v1495_v52, %v5865_v57  ;;  %v3799_v6 = vpop.f32.mrb[4].mxu0  ;;  %v1677_v7 = vsub.f32 %v5857_v46, %v6451_v36 }
 0x2cf   : > { %v5883_v28 = vand.u32 4294901760, %v3799_v6  ;;  %2884 = vst [vmem:[%s5837_s21 + $0x28] sm:$0xff] %v3799_v6  ;;  %v1507_v2 = vpop.f32.mrb[5].mxu0  ;;  %v6442_v11 = vand.u32 4294901760, %v5870_v54  ;;  %v1688_v52 = vand.u32 4294901760, %v1687_v9 }
 0x2d0   : > { %v5893_v48 = vand.u32 4294901760, %v1507_v2  ;;  %2883 = vst [vmem:[%s5837_s21 + $0x20] sm:$0xff] %v1507_v2  ;;  %v1678_v31 = vand.u32 4294901760, %v1677_v7  ;;  %v6444_v3 = vand.u32 4294901760, %v5876_v13  ;;  %v5911_v7 = vsub.f32 %v5679_v24, %v1615_v47 }
 0x2d1   : > { %v5903_v14 = vsub.f32 %v3799_v6, %v5883_v28  ;;  %v1707_v5 = vsub.f32 %v5870_v54, %v6442_v11  ;;  %v1867_v11 = vand.u32 4294901760, %v1866_v29 }
 0x2d2   : > { %v5914_v18 = vsub.f32 %v1507_v2, %v5893_v48  ;;  %v3802_v51 = vpop.f32.mrb[6].mxu0  ;;  %3847 = vmatprep.mubr.f32.mxu1 %v1678_v31  ;;  %v1697_v21 = vsub.f32 %v5876_v13, %v6444_v3  ;;  %v6450_v31 = vand.u32 4294901760, %v5900_v43  ;;  %v6453_v45 = vand.u32 4294901760, %v5911_v7 }
 0x2d3   : > { %v5919_v56 = vand.u32 4294901760, %v3802_v51  ;;  %2886 = vst [vmem:[%s5837_s21 + $0x38] sm:$0xff] %v3802_v51  ;;  %v1519_v9 = vpop.f32.mrb[7].mxu0  ;;  %3848 = vmatmul.mubr.f32.vlgmr.msra.gmra.mrb[0].mxu1 %v1688_v52  ;;  %v6446_v6 = vand.u32 4294901760, %v5903_v14  ;;  %v1708_v63 = vand.u32 4294901760, %v1707_v5  ;;  %v5946_v5 = vsub.f32 %v5695_v39, %v1618_v19 }
 0x2d4   : > { %v5923_v24 = vand.u32 4294901760, %v1519_v9  ;;  %2885 = vst [vmem:[%s5837_s21 + $0x30] sm:$0xff] %v1519_v9  ;;  %4378 = vmatpush3.bf16.xpose.msra.mxu1 %v5809_v32  ;;  %v1698_v47 = vand.u32 4294901760, %v1697_v21  ;;  %v6448_v2 = vand.u32 4294901760, %v5914_v18 }
 0x2d5   : > { %v5930_v3 = vsub.f32 %v3802_v51, %v5919_v56  ;;  %4380 = vmatprep.subr.bf16.mxu1 %v5881_v12  ;;  %v1727_v29 = vsub.f32 %v5903_v14, %v6446_v6 }
 0x2d6   : > { %v5938_v32 = vsub.f32 %v1519_v9, %v5923_v24  ;;  %v3805_v52 = vpop.f32.mrb[8].mxu0  ;;  %3850 = vmatprep.mubr.f32.mxu1 %v1698_v47  ;;  %v1717_v51 = vsub.f32 %v5914_v18, %v6448_v2  ;;  %v5952_v9 = vpack.c.bf16 %v1874_v0, %v1867_v11  ;;  %v5957_v47 = vsub.f32 %v5697_v61, %v1621_v20 }
 0x2d7   : > { %v5948_v21 = vand.u32 4294901760, %v3805_v52  ;;  %2888 = vst [vmem:[%s5837_s21 + $0x48] sm:$0xff] %v3805_v52  ;;  %v1531_v6 = vpop.f32.mrb[9].mxu0  ;;  %3851 = vmatmul.mubr.f32.gmra.mrb[2].mxu1 %v1708_v63  ;;  %v6452_v55 = vand.u32 4294901760, %v5930_v3  ;;  %v1880_v63 = vsub.f32 %v5900_v43, %v6450_v31  ;;  %v1728_v0 = vand.u32 4294901760, %v1727_v29 }
 0x2d8   : > { %v5959_v2 = vand.u32 4294901760, %v1531_v6  ;;  %2887 = vst [vmem:[%s5837_s21 + $0x40] sm:$0xff] %v1531_v6  ;;  %v1718_v39 = vand.u32 4294901760, %v1717_v51  ;;  %v6455_v19 = vand.u32 4294901760, %v5938_v32  ;;  %v1887_v20 = vsub.f32 %v5911_v7, %v6453_v45 }
 0x2d9   : > { %v5967_v34 = vsub.f32 %v3805_v52, %v5948_v21  ;;  %v1747_v61 = vsub.f32 %v5930_v3, %v6452_v55  ;;  %v6463_v31 = vand.u32 4294901760, %v5946_v5 }
 0x2da   : > { %v5976_v11 = vsub.f32 %v1531_v6, %v5959_v2  ;;  %v3808_v51 = vpop.f32.mrb[10].mxu0  ;;  %3853 = vmatprep.mubr.f32.mxu1 %v1718_v39  ;;  %v1737_v52 = vsub.f32 %v5938_v32, %v6455_v19  ;;  %v1881_v19 = vand.u32 4294901760, %v1880_v63  ;;  %v1888_v58 = vand.u32 4294901760, %v1887_v20 }
 0x2db   : > { %6585 = vst [vmem:[#allocation16_spill] sm:$0xff] %v5967_v34  ;;  %v5982_v29 = vand.u32 4294901760, %v3808_v51  ;;  %2890 = vst [vmem:[%s5837_s21 + $0x58] sm:$0xff] %v3808_v51  ;;  %v1543_v36 = vpop.f32.mrb[11].mxu0  ;;  %3854 = vmatmul.mubr.f32.gmra.mrb[4].mxu1 %v1728_v0  ;;  %v6459_v55 = vand.u32 4294901760, %v5967_v34  ;;  %v1748_v60 = vand.u32 4294901760, %v1747_v61  ;;  %v1894_v61 = vsub.f32 %v5946_v5, %v6463_v31 }
 0x2dc   : > { %6586 = vst [vmem:[#allocation17_spill] sm:$0xff] %v5976_v11  ;;  %v5987_v35 = vand.u32 4294901760, %v1543_v36  ;;  %2889 = vst [vmem:[%s5837_s21 + $0x50] sm:$0xff] %v1543_v36  ;;  %4382 = vmatpush3.bf16.xpose.msra.mxu1 %v5881_v12  ;;  %v1738_v6 = vand.u32 4294901760, %v1737_v52  ;;  %v6462_v39 = vand.u32 4294901760, %v5976_v11 }
 0x2dd   : > { %v5993_v1 = vsub.f32 %v3808_v51, %v5982_v29  ;;  %4384 = vmatprep.subr.bf16.mxu1 %v5952_v9  ;;  %v1767_v0 = vsub.f32 %v5967_v34, %v6459_v55 }
 0x2de   : > { %v6000_v45 = vsub.f32 %v1543_v36, %v5987_v35  ;;  %v3811_v12 = vpop.f32.mrb[12].mxu0  ;;  %3856 = vmatprep.mubr.f32.mxu1 %v1738_v6  ;;  %v1757_v63 = vsub.f32 %v5976_v11, %v6462_v39  ;;  %v6588_v36 = vand.u32 4294901760, %v5957_v47  ;;  %v6589_v6 = vand.u32 4294901760, %v5709_v23 }
 0x2df   : > { %6587 = vst [vmem:[#allocation18_spill] sm:$0xff] %v5993_v1  ;;  %v6008_v51 = vand.u32 4294901760, %v3811_v12  ;;  %2892 = vst [vmem:[%s5837_s21 + $0x68] sm:$0xff] %v3811_v12  ;;  %v1555_v52 = vpop.f32.mrb[13].mxu0  ;;  %3857 = vmatmul.mubr.f32.gmra.mrb[6].mxu1 %v1748_v60  ;;  %v6590_v60 = vand.u32 4294901760, %v5711_v53  ;;  %v6591_v38 = vand.u32 4294901760, %v5993_v1 }
 0x2e0   : > { %v1901_v55 = vsub.f32 %v5957_v47, %v6588_v36  ;;  %v6018_v22 = vsub.f32 %v5709_v23, %v6589_v6  ;;  %v6020_v39 = vand.u32 4294901760, %v1555_v52  ;;  %2891 = vst [vmem:[%s5837_s21 + $0x60] sm:$0xff] %v1555_v52  ;;  %v1758_v31 = vand.u32 4294901760, %v1757_v63 }
 0x2e1   : > { %v6476_v8 = vand.u32 4294901760, %v6000_v45  ;;  %v6027_v20 = vsub.f32 %v5711_v53, %v6590_v60  ;;  %v6030_v62 = vsub.f32 %v3811_v12, %v6008_v51  ;;  %v1768_v36 = vand.u32 4294901760, %v1767_v0 }
 0x2e2   : > { %v1787_v23 = vsub.f32 %v5993_v1, %v6591_v38  ;;  %v4387_v6 = vpack.c.bf16 %v1888_v58, %v1881_v19  ;;  %v6036_v4 = vsub.f32 %v1555_v52, %v6020_v39  ;;  %v3814_v63 = vpop.f32.mrb[14].mxu0  ;;  %3859 = vmatprep.mubr.f32.mxu1 %v1758_v31  ;;  %v1895_v60 = vand.u32 4294901760, %v1894_v61 }
 0x2e3   : > { %v1777_v53 = vsub.f32 %v6000_v45, %v6476_v8  ;;  %v6041_v34 = vand.u32 4294901760, %v3814_v63  ;;  %2894 = vst [vmem:[%s5837_s21 + $0x78] sm:$0xff] %v3814_v63  ;;  %v1567_v0 = vpop.f32.mrb[15].mxu0  ;;  %3860 = vmatmul.mubr.f32.gmra.mrb[8].mxu1 %v1768_v36  ;;  %v6479_v12 = vand.u32 4294901760, %v6030_v62  ;;  %v1902_v11 = vand.u32 4294901760, %v1901_v55 }
 0x2e4   : > { %v6481_v38 = vand.u32 4294901760, %v6018_v22  ;;  %v6046_v58 = vand.u32 4294901760, %v1567_v0  ;;  %2893 = vst [vmem:[%s5837_s21 + $0x70] sm:$0xff] %v1567_v0  ;;  %4386 = vmatpush3.bf16.xpose.msra.mxu1 %v5952_v9  ;;  %v6480_v19 = vand.u32 4294901760, %v6036_v4  ;;  %v1788_v8 = vand.u32 4294901760, %v1787_v23 }
 0x2e5   : > { %v1778_v31 = vand.u32 4294901760, %v1777_v53  ;;  %v6053_v52 = vsub.f32 %v3814_v63, %v6041_v34  ;;  %4388 = vmatprep.subr.bf16.mxu1 %v4387_v6  ;;  %v1807_v55 = vsub.f32 %v6030_v62, %v6479_v12  ;;  %v4391_v61 = vpack.c.bf16 %v1902_v11, %v1895_v60 }
 0x2e6   : > { %v6059_v36 = vsub.f32 %v1567_v0, %v6046_v58  ;;  %v1797_v9 = vsub.f32 %v6036_v4, %v6480_v19  ;;  %v1908_v1 = vsub.f32 %v6018_v22, %v6481_v38  ;;  %v6593_v12 = vand.u32 4294901760, %v6027_v20 }
 0x2e7   : > { %6592 = vst [vmem:[#allocation19_spill] sm:$0xff] %v6053_v52  ;;  %3862 = vmatprep.mubr.f32.mxu1 %v1778_v31  ;;  %v6482_v53 = vand.u32 4294901760, %v6053_v52  ;;  %v1808_v31 = vand.u32 4294901760, %v1807_v55  ;;  %v6595_v60 = vand.u32 4294901760, %v5727_v10 }
 0x2e8   : > { %3863 = vmatmul.mubr.f32.gmra.mrb[10].mxu1 %v1788_v8  ;;  %v1816_v63 = vand.u32 4294901760, %v6059_v36  ;;  %v1798_v23 = vand.u32 4294901760, %v1797_v9  ;;  %v1915_v0 = vsub.f32 %v6027_v20, %v6593_v12  ;;  %v6594_v8 = vand.u32 4294901760, %v5725_v27 }
 0x2e9   : > { %v1827_v19 = vsub.f32 %v6053_v52, %v6482_v53  ;;  %v6083_v9 = vsub.f32 %v5727_v10, %v6595_v60  ;;  %v1909_v38 = vand.u32 4294901760, %v1908_v1 }
 0x2ea   : > { %v6078_v11 = vsub.f32 %v5725_v27, %v6594_v8  ;;  %3865 = vmatprep.mubr.f32.mxu1 %v1798_v23  ;;  %v1817_v12 = vsub.f32 %v6059_v36, %v1816_v63  ;;  %v1916_v52 = vand.u32 4294901760, %v1915_v0  ;;  %v6486_v0 = vand.u32 4294901760, %v5812_v33 }
 0x2eb   : > { %v1828_v53 = vand.u32 4294901760, %v1827_v19  ;;  %v6487_v8 = vand.u32 4294901760, %v6083_v9 }
 0x2ec   : > { %3866 = vmatmul.mubr.f32.gmra.mrb[12].mxu1 %v1808_v31  ;;  %v1818_v55 = vand.u32 4294901760, %v1817_v12  ;;  %v6488_v27 = vand.u32 4294901760, %v6078_v11  ;;  %v4395_v10 = vpack.c.bf16 %v1916_v52, %v1909_v38  ;;  %v6485_v31 = vand.u32 4294901760, %v5814_v25 }
 0x2ed   : > { %4390 = vmatpush3.bf16.xpose.msra.mxu1 %v4387_v6  ;;  %v1929_v1 = vsub.f32 %v6083_v9, %v6487_v8  ;;  %v1936_v38 = vsub.f32 %v5812_v33, %v6486_v0  ;;  %v6610_v8 = vand.u32 4294901760, %v5854_v17 }
 0x2ee   : > { %4392 = vmatprep.subr.bf16.mxu1 %v4391_v61  ;;  %3868 = vmatprep.mubr.f32.mxu1 %v1818_v55  ;;  %v1922_v23 = vsub.f32 %v6078_v11, %v6488_v27  ;;  %v1943_v52 = vsub.f32 %v5814_v25, %v6485_v31  ;;  %v4407_v55 = vpack.c.bf16 %v5797_v26, %v5792_v41  ;;  %v6611_v27 = vand.u32 4294901760, %v5876_v13 }
 0x2ef   : > { %v1930_v19 = vand.u32 4294901760, %v1929_v1  ;;  %v1937_v60 = vand.u32 4294901760, %v1936_v38  ;;  %v4419_v1 = vpack.c.bf16 %v5911_v7, %v5900_v43  ;;  %v4435_v38 = vpack.c.bf16 %v5814_v25, %v5812_v33 }
 0x2f0   : > { %3869 = vmatmul.mubr.f32.gmra.mrb[14].mxu1 %v1828_v53  ;;  %v1923_v6 = vand.u32 4294901760, %v1922_v23  ;;  %v4411_v23 = vpack.c.bf16 %v5824_v59, %v5819_v44 }
 0x2f1   : > { %3903 = vmatprep.mubr.f32.mxu1 %v5850_v50 }
 0x2f2   : > { %v4399_v53 = vpack.c.bf16 %v1930_v19, %v1923_v6  ;;  %v4423_v6 = vpack.c.bf16 %v5957_v47, %v5946_v5  ;;  %v4427_v19 = vpack.c.bf16 %v6027_v20, %v6018_v22 }
 0x2f5   : > { %4394 = vmatpush3.bf16.xpose.msra.mxu1 %v4391_v61  ;;  %v1944_v61 = vand.u32 4294901760, %v1943_v52  ;;  %v6596_v52 = vld [vmem:[#allocation17_spill] sm:$0xff] }
 0x2f6   : > { %4396 = vmatprep.subr.bf16.mxu1 %v4395_v10 }
 0x2f7   : > { %v4403_v12 = vpack.c.bf16 %v1944_v61, %v1937_v60  ;;  %v6597_v60 = vld [vmem:[#allocation16_spill] sm:$0xff]  ;;  %v6598_v61 = vld [vmem:[#allocation29_spill] sm:$0xff] }
 0x2fd   : > { %4398 = vmatpush3.bf16.xpose.msra.mxu1 %v4395_v10  ;;  %v4415_v10 = vpack.c.bf16 %v5848_v49, %v5843_v40 }
 0x2fe   : > { %4400 = vmatprep.subr.bf16.mxu1 %v4399_v53 }
 0x305   : > { %4402 = vmatpush3.bf16.xpose.msra.mxu1 %v4399_v53  ;;  %v4431_v53 = vpack.c.bf16 %v6083_v9, %v6078_v11 }
 0x306   : > { %4404 = vmatprep.subr.bf16.mxu1 %v4403_v12 }
 0x30d   : > { %4406 = vmatpush3.bf16.xpose.msra.mxu1 %v4403_v12  ;;  %v6599_v12 = vld [vmem:[#allocation18_spill] sm:$0xff] }
 0x30e   : > { %4408 = vmatprep.subr.bf16.mxu1 %v4407_v55 }
 0x314   : > { %3904 = vmatmul.mubr.f32.vlgmr.msra.gmra.mrb[0].mxu1 %v5834_v37 }
 0x315   : > { %3906 = vmatprep.mubr.f32.mxu1 %v5865_v57  ;;  %4410 = vmatpush3.bf16.xpose.msra.mxu1 %v4407_v55  ;;  %v6600_v55 = vld [vmem:[#allocation30_spill] sm:$0xff] }
 0x316   : > { %4412 = vmatprep.subr.bf16.mxu1 %v4411_v23 }
 0x318   : > { %3907 = vmatmul.mubr.f32.gmra.mrb[2].mxu1 %v5859_v16 }
 0x319   : > { %3909 = vmatprep.mubr.f32.mxu1 %v5893_v48 }
 0x31c   : > { %3910 = vmatmul.mubr.f32.gmra.mrb[4].mxu1 %v5883_v28 }
 0x31d   : > { %3912 = vmatprep.mubr.f32.mxu1 %v5923_v24  ;;  %4414 = vmatpush3.bf16.xpose.msra.mxu1 %v4411_v23  ;;  %v6601_v23 = vld [vmem:[#allocation19_spill] sm:$0xff] }
 0x31e   : > { %4416 = vmatprep.subr.bf16.mxu1 %v4415_v10 }
 0x320   : > { %3913 = vmatmul.mubr.f32.gmra.mrb[6].mxu1 %v5919_v56 }
 0x321   : > { %3915 = vmatprep.mubr.f32.mxu1 %v5959_v2 }
 0x324   : > { %3916 = vmatmul.mubr.f32.gmra.mrb[8].mxu1 %v5948_v21 }
 0x325   : > { %3918 = vmatprep.mubr.f32.mxu1 %v5987_v35  ;;  %4418 = vmatpush3.bf16.xpose.msra.mxu1 %v4415_v10  ;;  %v6602_v10 = vand.u32 4294901760, %v5857_v46 }
 0x326   : > { %4420 = vmatprep.subr.bf16.mxu1 %v4419_v1 }
 0x328   : > { %3919 = vmatmul.mubr.f32.gmra.mrb[10].mxu1 %v5982_v29 }
 0x329   : > { %3921 = vmatprep.mubr.f32.mxu1 %v6020_v39 }
 0x32c   : > { %3922 = vmatmul.mubr.f32.gmra.mrb[12].mxu1 %v6008_v51 }
 0x32d   : > { %3924 = vmatprep.mubr.f32.mxu1 %v6046_v58  ;;  %4422 = vmatpush3.bf16.xpose.msra.mxu1 %v4419_v1  ;;  %v6603_v1 = vld [vmem:[#allocation15_spill] sm:$0xff] }
 0x32e   : > { %4424 = vmatprep.subr.bf16.mxu1 %v4423_v6 }
 0x330   : > { %3925 = vmatmul.mubr.f32.gmra.mrb[14].mxu1 %v6041_v34 }
 0x331   : > { %3959 = vmatprep.mubr.f32.mxu1 %v5857_v46  ;;  %v6608_v46 = vand.u32 4294901760, %v5819_v44  ;;  %v6615_v44 = vand.u32 4294901760, %v5848_v49 }
 0x335   : > { %4426 = vmatpush3.bf16.xpose.msra.mxu1 %v4423_v6  ;;  %v6604_v6 = vld [vmem:[#allocation31_spill] sm:$0xff] }
 0x336   : > { %4428 = vmatprep.subr.bf16.mxu1 %v4427_v19 }
 0x33d   : > { %4430 = vmatpush3.bf16.xpose.msra.mxu1 %v4427_v19  ;;  %v6605_v19 = vld [vmem:[#allocation32_spill] sm:$0xff] }
 0x33e   : > { %4432 = vmatprep.subr.bf16.mxu1 %v4431_v53 }
 0x345   : > { %4434 = vmatpush3.bf16.xpose.msra.mxu1 %v4431_v53  ;;  %v6606_v53 = vand.u32 4294901760, %v5792_v41  ;;  %v6612_v41 = vand.u32 4294901760, %v5870_v54 }
 0x346   : > { %4436 = vmatprep.subr.bf16.mxu1 %v4435_v38 }
 0x34d   : > { %4438 = vmatpush3.bf16.xpose.msra.mxu1 %v4435_v38  ;;  %v6607_v38 = vand.u32 4294901760, %v5797_v26  ;;  %v6613_v26 = vand.u32 4294901760, %v5914_v18 }
 0x34e   : > { %4440 = vmatprep.subr.bf16.mxu1 %v5650_v42 }
 0x34f   : > { %v4471_v31 = vpack.c.bf16 %v6607_v38, %v6606_v53  ;;  %v6614_v53 = vand.u32 4294901760, %v5843_v40  ;;  %v6616_v38 = vand.u32 4294901760, %v5903_v14  ;;  %v6621_v40 = vand.u32 4294901760, %v5911_v7 }
 0x354   : > { %3960 = vmatmul.mubr.f32.vlgmr.msra.gmra.mrb[0].mxu1 %v5854_v17  ;;  %v6617_v17 = vand.u32 4294901760, %v5938_v32 }
 0x355   : > { %3962 = vmatprep.mubr.f32.mxu1 %v5876_v13  ;;  %4442 = vmatpush3.bf16.xpose.msra.mxu1 %v5650_v42  ;;  %v6618_v13 = vand.u32 4294901760, %v5930_v3 }
 0x356   : > { %4444 = vmatprep.subr.bf16.mxu1 %v5656_v15 }
 0x358   : > { %3963 = vmatmul.mubr.f32.gmra.mrb[2].mxu1 %v5870_v54  ;;  %v6619_v54 = vand.u32 4294901760, %v6596_v52 }
 0x359   : > { %3965 = vmatprep.mubr.f32.mxu1 %v5914_v18  ;;  %v6620_v18 = vand.u32 4294901760, %v5900_v43  ;;  %v6627_v43 = vand.u32 4294901760, %v5957_v47  ;;  %v6633_v47 = vand.u32 4294901760, %v6083_v9 }
 0x35b   : > { %v4483_v49 = vpack.c.bf16 %v6621_v40, %v6620_v18 }
 0x35c   : > { %3966 = vmatmul.mubr.f32.gmra.mrb[4].mxu1 %v5903_v14  ;;  %v6623_v14 = vand.u32 4294901760, %v6000_v45 }
 0x35d   : > { %3968 = vmatprep.mubr.f32.mxu1 %v5938_v32  ;;  %4446 = vmatpush3.bf16.xpose.msra.mxu1 %v5656_v15  ;;  %v6624_v32 = vand.u32 4294901760, %v6599_v12 }
 0x35e   : > { %4448 = vmatprep.subr.bf16.mxu1 %v5675_v30 }
 0x360   : > { %3969 = vmatmul.mubr.f32.gmra.mrb[6].mxu1 %v5930_v3  ;;  %v6625_v3 = vand.u32 4294901760, %v6036_v4 }
 0x361   : > { %3971 = vmatprep.mubr.f32.mxu1 %v6596_v52  ;;  %v6635_v52 = vand.u32 4294901760, %v5814_v25 }
 0x364   : > { %3972 = vmatmul.mubr.f32.gmra.mrb[8].mxu1 %v6597_v60 }
 0x365   : > { %3974 = vmatprep.mubr.f32.mxu1 %v6000_v45  ;;  %4450 = vmatpush3.bf16.xpose.msra.mxu1 %v5675_v30  ;;  %v6629_v45 = vand.u32 4294901760, %v6601_v23 }
 0x366   : > { %4452 = vmatprep.subr.bf16.mxu1 %v6598_v61 }
 0x368   : > { %3975 = vmatmul.mubr.f32.gmra.mrb[10].mxu1 %v6599_v12 }
 0x369   : > { %3977 = vmatprep.mubr.f32.mxu1 %v6036_v4  ;;  %v6630_v4 = vand.u32 4294901760, %v6018_v22 }
 0x36c   : > { %3978 = vmatmul.mubr.f32.gmra.mrb[12].mxu1 %v6030_v62 }
 0x36d   : > { %3980 = vmatprep.mubr.f32.mxu1 %v6059_v36  ;;  %4454 = vmatpush3.bf16.xpose.msra.mxu1 %v6598_v61 }
 0x36e   : > { %4456 = vmatprep.subr.bf16.mxu1 %v6600_v55 }
 0x370   : > { %3981 = vmatmul.mubr.f32.gmra.mrb[14].mxu1 %v6601_v23 }
 0x371   : > { %4015 = vmatprep.mubr.f32.mxu1 %v6602_v10  ;;  %v6609_v10 = vand.u32 4294901760, %v5824_v59  ;;  %v4479_v59 = vpack.c.bf16 %v6615_v44, %v6614_v53 }
 0x373   : > { %v4475_v0 = vpack.c.bf16 %v6609_v10, %v6608_v46 }
 0x375   : > { %4458 = vmatpush3.bf16.xpose.msra.mxu1 %v6600_v55 }
 0x376   : > { %4460 = vmatprep.subr.bf16.mxu1 %v6603_v1 }
 0x37d   : > { %4462 = vmatpush3.bf16.xpose.msra.mxu1 %v6603_v1 }
 0x37e   : > { %4464 = vmatprep.subr.bf16.mxu1 %v6604_v6 }
 0x385   : > { %4466 = vmatpush3.bf16.xpose.msra.mxu1 %v6604_v6 }
 0x386   : > { %4468 = vmatprep.subr.bf16.mxu1 %v6605_v19 }
 0x38d   : > { %4470 = vmatpush3.bf16.xpose.msra.mxu1 %v6605_v19 }
 0x38e   : > { %4472 = vmatprep.subr.bf16.mxu1 %v4471_v31 }
 0x394   : > { %4016 = vmatmul.mubr.f32.vlgmr.msra.gmra.mrb[0].mxu1 %v6610_v8  ;;  %v6626_v8 = vand.u32 4294901760, %v5946_v5  ;;  %v6631_v5 = vand.u32 4294901760, %v6027_v20 }
 0x395   : > { %4018 = vmatprep.mubr.f32.mxu1 %v6611_v27  ;;  %4474 = vmatpush3.bf16.xpose.msra.mxu1 %v4471_v31  ;;  %v6622_v27 = vand.u32 4294901760, %v6597_v60 }
 0x396   : > { %4476 = vmatprep.subr.bf16.mxu1 %v4475_v0  ;;  %v4487_v7 = vpack.c.bf16 %v6627_v43, %v6626_v8  ;;  %v4491_v31 = vpack.c.bf16 %v6631_v5, %v6630_v4 }
 0x398   : > { %4019 = vmatmul.mubr.f32.gmra.mrb[2].mxu1 %v6612_v41 }
 0x399   : > { %4021 = vmatprep.mubr.f32.mxu1 %v6613_v26 }
 0x39c   : > { %4022 = vmatmul.mubr.f32.gmra.mrb[4].mxu1 %v6616_v38 }
 0x39d   : > { %4024 = vmatprep.mubr.f32.mxu1 %v6617_v17  ;;  %4478 = vmatpush3.bf16.xpose.msra.mxu1 %v4475_v0  ;;  %v6628_v0 = vand.u32 4294901760, %v6030_v62  ;;  %v6632_v62 = vand.u32 4294901760, %v6078_v11 }
 0x39e   : > { %4480 = vmatprep.subr.bf16.mxu1 %v4479_v59 }
 0x39f   : > { %v4495_v36 = vpack.c.bf16 %v6633_v47, %v6632_v62 }
 0x3a0   : > { %4025 = vmatmul.mubr.f32.gmra.mrb[6].mxu1 %v6618_v13 }
 0x3a1   : > { %4027 = vmatprep.mubr.f32.mxu1 %v6619_v54 }
 0x3a4   : > { %4028 = vmatmul.mubr.f32.gmra.mrb[8].mxu1 %v6622_v27 }
 0x3a5   : > { %4030 = vmatprep.mubr.f32.mxu1 %v6623_v14  ;;  %4482 = vmatpush3.bf16.xpose.msra.mxu1 %v4479_v59 }
 0x3a6   : > { %4484 = vmatprep.subr.bf16.mxu1 %v4483_v49 }
 0x3a8   : > { %4031 = vmatmul.mubr.f32.gmra.mrb[10].mxu1 %v6624_v32 }
 0x3a9   : > { %4033 = vmatprep.mubr.f32.mxu1 %v6625_v3 }
 0x3ac   : > { %4034 = vmatmul.mubr.f32.gmra.mrb[12].mxu1 %v6628_v0 }
 0x3ad   : > { %4036 = vmatprep.mubr.f32.mxu1 %v1816_v63  ;;  %4486 = vmatpush3.bf16.xpose.msra.mxu1 %v4483_v49  ;;  %v6634_v63 = vand.u32 4294901760, %v5812_v33 }
 0x3ae   : > { %4488 = vmatprep.subr.bf16.mxu1 %v4487_v7 }
 0x3af   : > { %v4499_v60 = vpack.c.bf16 %v6635_v52, %v6634_v63 }
 0x3b0   : > { %4037 = vmatmul.mubr.f32.gmra.mrb[14].mxu1 %v6629_v45 }
 0x3b1   : > { %4071 = vmatprep.mubr.f32.mxu1 %v5850_v50 }
 0x3b5   : > { %4490 = vmatpush3.bf16.xpose.msra.mxu1 %v4487_v7 }
 0x3b6   : > { %4492 = vmatprep.subr.bf16.mxu1 %v4491_v31 }
 0x3bd   : > { %4494 = vmatpush3.bf16.xpose.msra.mxu1 %v4491_v31 }
 0x3be   : > { %4496 = vmatprep.subr.bf16.mxu1 %v4495_v36 }
 0x3c5   : > { %4498 = vmatpush3.bf16.xpose.msra.mxu1 %v4495_v36 }
 0x3c6   : > { %4500 = vmatprep.subr.bf16.mxu1 %v4499_v60 }
 0x3cd   : > { %4502 = vmatpush3.bf16.xpose.msra.mxu1 %v4499_v60 }
 0x3ce   : > { %4504 = vmatprep.subr.bf16.mxu1 %v5650_v42 }
 0x3d4   : > { %4072 = vmatmul.mubr.f32.vlgmr.msra.gmra.mrb[0].mxu1 %v5834_v37 }
 0x3d5   : > { %4074 = vmatprep.mubr.f32.mxu1 %v5865_v57  ;;  %4506 = vmatpush3.bf16.xpose.msra.mxu1 %v5650_v42 }
 0x3d6   : > { %4508 = vmatprep.subr.bf16.mxu1 %v5656_v15 }
 0x3d8   : > { %4075 = vmatmul.mubr.f32.gmra.mrb[2].mxu1 %v5859_v16 }
 0x3d9   : > { %4077 = vmatprep.mubr.f32.mxu1 %v5893_v48 }
 0x3dc   : > { %4078 = vmatmul.mubr.f32.gmra.mrb[4].mxu1 %v5883_v28 }
 0x3dd   : > { %4080 = vmatprep.mubr.f32.mxu1 %v5923_v24  ;;  %4510 = vmatpush3.bf16.xpose.msra.mxu1 %v5656_v15 }
 0x3de   : > { %4512 = vmatprep.subr.bf16.mxu1 %v5675_v30 }
 0x3e0   : > { %4081 = vmatmul.mubr.f32.gmra.mrb[6].mxu1 %v5919_v56 }
 0x3e1   : > { %4083 = vmatprep.mubr.f32.mxu1 %v5959_v2 }
 0x3e4   : > { %4084 = vmatmul.mubr.f32.gmra.mrb[8].mxu1 %v5948_v21 }
 0x3e5   : > { %4086 = vmatprep.mubr.f32.mxu1 %v5987_v35  ;;  %4514 = vmatpush3.bf16.xpose.msra.mxu1 %v5675_v30 }
 0x3e6   : > { %4516 = vmatprep.subr.bf16.mxu1 %v6598_v61 }
 0x3e8   : > { %4087 = vmatmul.mubr.f32.gmra.mrb[10].mxu1 %v5982_v29 }
 0x3e9   : > { %4089 = vmatprep.mubr.f32.mxu1 %v6020_v39 }
 0x3ec   : > { %4090 = vmatmul.mubr.f32.gmra.mrb[12].mxu1 %v6008_v51 }
 0x3ed   : > { %4092 = vmatprep.mubr.f32.mxu1 %v6046_v58  ;;  %4518 = vmatpush3.bf16.xpose.msra.mxu1 %v6598_v61 }
 0x3ee   : > { %4520 = vmatprep.subr.bf16.mxu1 %v6600_v55 }
 0x3f0   : > { %4093 = vmatmul.mubr.f32.gmra.mrb[14].mxu1 %v6041_v34 }
 0x3f1   : > { %4127 = vmatprep.mubr.f32.mxu1 %v5850_v50 }
 0x3f5   : > { %4522 = vmatpush3.bf16.xpose.msra.mxu1 %v6600_v55 }
 0x3f6   : > { %4524 = vmatprep.subr.bf16.mxu1 %v6603_v1 }
 0x3fd   : > { %4526 = vmatpush3.bf16.xpose.msra.mxu1 %v6603_v1 }
 0x3fe   : > { %4528 = vmatprep.subr.bf16.mxu1 %v6604_v6 }
 0x405   : > { %4530 = vmatpush3.bf16.xpose.msra.mxu1 %v6604_v6 }
 0x406   : > { %4532 = vmatprep.subr.bf16.mxu1 %v6605_v19 }
 0x40d   : > { %4534 = vmatpush3.bf16.xpose.msra.mxu1 %v6605_v19 }
 0x414   : > { %4128 = vmatmul.mubr.f32.vlgmr.msra.gmra.mrb[0].mxu1 %v5834_v37 }
 0x415   : > { %4130 = vmatprep.mubr.f32.mxu1 %v5865_v57 }
 0x418   : > { %4131 = vmatmul.mubr.f32.gmra.mrb[2].mxu1 %v5859_v16 }
 0x419   : > { %4133 = vmatprep.mubr.f32.mxu1 %v5893_v48 }
 0x41c   : > { %4134 = vmatmul.mubr.f32.gmra.mrb[4].mxu1 %v5883_v28 }
 0x41d   : > { %4136 = vmatprep.mubr.f32.mxu1 %v5923_v24 }
 0x420   : > { %4137 = vmatmul.mubr.f32.gmra.mrb[6].mxu1 %v5919_v56 }
 0x421   : > { %4139 = vmatprep.mubr.f32.mxu1 %v5959_v2 }
 0x424   : > { %4140 = vmatmul.mubr.f32.gmra.mrb[8].mxu1 %v5948_v21 }
 0x425   : > { %4142 = vmatprep.mubr.f32.mxu1 %v5987_v35 }
 0x428   : > { %4143 = vmatmul.mubr.f32.gmra.mrb[10].mxu1 %v5982_v29 }
 0x429   : > { %4145 = vmatprep.mubr.f32.mxu1 %v6020_v39 }
 0x42c   : > { %4146 = vmatmul.mubr.f32.gmra.mrb[12].mxu1 %v6008_v51 }
 0x42d   : > { %4148 = vmatprep.mubr.f32.mxu1 %v6046_v58 }
 0x430   : > { %4149 = vmatmul.mubr.f32.gmra.mrb[14].mxu1 %v6041_v34 }
 0x431   : > { %4870 = shalt.err (!%p4867_p1)
}
 0x432   : > { %s4871_s5 = scalar_lea.hbm %s6287_s6, 2048  ;;  %s4875_s24 = scalar_lea.hbm %s6395_s3, 4096 }
 0x433   : > { %p4872_p13 = scmp.ne.s32.totalorder %s6287_s6, %s4871_s5  ;;  %p4876_p4 = scmp.lt.u32.totalorder %s6287_s6, %s6395_s3 }
 0x434   : > { %p4877_p5 = scmp.lt.u32.totalorder %s4875_s24, %s4871_s5  ;;  %p4879_p11 = scmp.lt.u32.totalorder %s4871_s5, %s6287_s6 }
 0x435   : > { %p4873_p6 = pnand %p4872_p13, %p6636_p0 }
 0x436   : > { %p4878_p8 = por %p4877_p5, %p4876_p4 }
 0x437   : > { %p4874_p10 = pneg %p4873_p6 }
 0x438   : > { %p4880_p2 = por %p4879_p11, %p4878_p8 }
 0x43a   : > { %p4881_p3 = pnand %p4880_p2, %p4874_p10 }
 0x43c   : > { %4884 = shalt.err (!%p4881_p3)
}
 0x43d   : > { %s4967_s30 = smov 128   ;;  %s4968_s28 = smov 8  }
 0x43e   : > { %4705 = dma.vmem_to_hbm [thread:$0]  (%p6636_p0), %s6289_s11, 2048, %s6287_s6, %s2912_s7, %s4967_s30, %s4967_s30, %s4968_s28  }
 0x43f   : > { %s6319_s27 = scalar_lea.vmem [#allocation9], %s5179_s10  ;;  %s6341_s7 = scalar_lea.hbm %s6396_s4, %s3093_s23 }
 0x440   : > { %s2946_s10 = sshll.u32 %s6319_s27, 4  ;;  %s2917_s20 = scalar_lea.sflag [#allocation10], %s5176_s8  ;;  %s6343_s10 = int_to_ptr.vmem [resolvable:$true] %s2946_s10 }
 0x441   : > { %s4885_s29 = scalar_lea.vmem %s6343_s10, 2048  ;;  %s4969_s19 = smov [#allocation9]  }
 0x442   : > { %p4886_p7 = scmp.ne.s32.totalorder %s6343_s10, %s4885_s29  ;;  %s4889_s5 = sshll.u32 %s4969_s19, 4  ;;  %s4890_s5 = int_to_ptr.vmem [resolvable:$false] %s4889_s5 }
 0x443   : > { %s4891_s9 = scalar_lea.vmem %s4890_s5, 4096  ;;  %p4892_p1 = scmp.lt.s32.totalorder %s6343_s10, %s4890_s5 }
 0x444   : > { %p4887_p9 = pnand %p4886_p7, %p6636_p0  ;;  %p4893_p13 = scmp.lt.s32.totalorder %s4891_s9, %s4885_s29 }
 0x446   : > { %p4888_p12 = pneg %p4887_p9  ;;  %p4894_p6 = por %p4893_p13, %p4892_p1 }
 0x448   : > { %p4895_p10 = pnand %p4894_p6, %p4888_p12 }
 0x4e7   : > { %v4129_v42 = vpop.f32.mrb[0].mxu1 }
 0x4e8   : > { %2896 = vst [vmem:[%s6319_s27 + $0x8] sm:$0xff] %v4129_v42  ;;  %v2785_v15 = vpop.f32.mrb[1].mxu1 }
 0x4e9   : > { %2895 = vst [vmem:[%s6319_s27] sm:$0xff] %v2785_v15 }
 0x4eb   : > { %v4132_v30 = vpop.f32.mrb[2].mxu1 }
 0x4ec   : > { %2898 = vst [vmem:[%s6319_s27 + $0x18] sm:$0xff] %v4132_v30  ;;  %v2797_v35 = vpop.f32.mrb[3].mxu1 }
 0x4ed   : > { %2897 = vst [vmem:[%s6319_s27 + $0x10] sm:$0xff] %v2797_v35 }
 0x4ef   : > { %v4135_v22 = vpop.f32.mrb[4].mxu1 }
 0x4f0   : > { %2900 = vst [vmem:[%s6319_s27 + $0x28] sm:$0xff] %v4135_v22  ;;  %v2809_v34 = vpop.f32.mrb[5].mxu1 }
 0x4f1   : > { %2899 = vst [vmem:[%s6319_s27 + $0x20] sm:$0xff] %v2809_v34 }
 0x4f3   : > { %v4138_v33 = vpop.f32.mrb[6].mxu1 }
 0x4f4   : > { %2902 = vst [vmem:[%s6319_s27 + $0x38] sm:$0xff] %v4138_v33  ;;  %v2821_v25 = vpop.f32.mrb[7].mxu1 }
 0x4f5   : > { %2901 = vst [vmem:[%s6319_s27 + $0x30] sm:$0xff] %v2821_v25 }
 0x4f7   : > { %v4141_v37 = vpop.f32.mrb[8].mxu1 }
 0x4f8   : > { %2904 = vst [vmem:[%s6319_s27 + $0x48] sm:$0xff] %v4141_v37  ;;  %v2833_v50 = vpop.f32.mrb[9].mxu1 }
 0x4f9   : > { %2903 = vst [vmem:[%s6319_s27 + $0x40] sm:$0xff] %v2833_v50 }
 0x4fb   : > { %v4144_v16 = vpop.f32.mrb[10].mxu1 }
 0x4fc   : > { %2906 = vst [vmem:[%s6319_s27 + $0x58] sm:$0xff] %v4144_v16  ;;  %v2845_v57 = vpop.f32.mrb[11].mxu1 }
 0x4fd   : > { %2905 = vst [vmem:[%s6319_s27 + $0x50] sm:$0xff] %v2845_v57 }
 0x4ff   : > { %v4147_v28 = vpop.f32.mrb[12].mxu1 }
 0x500   : > { %2908 = vst [vmem:[%s6319_s27 + $0x68] sm:$0xff] %v4147_v28  ;;  %v2857_v48 = vpop.f32.mrb[13].mxu1 }
 0x501   : > { %2907 = vst [vmem:[%s6319_s27 + $0x60] sm:$0xff] %v2857_v48 }
 0x503   : > { %v4150_v56 = vpop.f32.mrb[14].mxu1 }
 0x504   : > { %2910 = vst [vmem:[%s6319_s27 + $0x78] sm:$0xff] %v4150_v56  ;;  %v2869_v24 = vpop.f32.mrb[15].mxu1 }
 0x505   : > { %2909 = vst [vmem:[%s6319_s27 + $0x70] sm:$0xff] %v2869_v24 }
 0x506   : > { %4898 = shalt.err (!%p4895_p10)
}
 0x507   : > { %s4899_s23 = scalar_lea.hbm %s6341_s7, 2048  ;;  %s4903_s21 = scalar_lea.hbm %s6396_s4, 4096 }
 0x508   : > { %p4900_p4 = scmp.ne.s32.totalorder %s6341_s7, %s4899_s23  ;;  %p4904_p11 = scmp.lt.u32.totalorder %s6341_s7, %s6396_s4 }
 0x509   : > { %p4905_p2 = scmp.lt.u32.totalorder %s4903_s21, %s4899_s23  ;;  %p4907_p7 = scmp.lt.u32.totalorder %s4899_s23, %s6341_s7 }
 0x50a   : > { %p4901_p5 = pnand %p4900_p4, %p6636_p0 }
 0x50b   : > { %p4906_p3 = por %p4905_p2, %p4904_p11 }
 0x50c   : > { %p4902_p8 = pneg %p4901_p5 }
 0x50d   : > { %p4908_p9 = por %p4907_p7, %p4906_p3 }
 0x50f   : > { %p4909_p12 = pnand %p4908_p9, %p4902_p8 }
 0x511   : > { %4912 = shalt.err (!%p4909_p12)
}
 0x512   : > { %4706 = dma.vmem_to_hbm [thread:$0]  (%p6636_p0), %s6343_s10, 2048, %s6341_s7, %s2917_s20, %s4967_s30, %s4967_s30, %s4968_s28  }
 0x513 PF: > { %s2961_s11 = sand.u32 1, %s4947_s15   ;;  %p6637_p1 = scmp.ne.s32.totalorder %s6490_s22, 0 }
 0x514   : > { %p6638_p13 = scmp.ge.s32.totalorder %s4959_s18, 2  ;;  %s2962_s6 = scalar_lea.sflag [#allocation4], %s2961_s11 }
 0x516   : > { %p4721_p6 = pnand %p6638_p13, %p6637_p1 }
 0x518   : > { %4938 = dma.done.wait (!%p4721_p6), %s2962_s6, 2048  }
 0x519   : > { %4940 = vsyncadd (!%p4721_p6), %s2962_s6, 4294965248  ;;  %s2971_s13 = scalar_lea.sflag [#allocation10], %s2961_s11 }
 0x51a   : > { %4942 = dma.done.wait (!%p4721_p6), %s2971_s13, 2048  }
 0x51b   : > { %4944 = vsyncadd (!%p4721_p6), %s2971_s13, 4294965248  ;;  %p22_p0 = scmp.ge.s32.totalorder %s5111_s26, 4   ;;  %s6639_s15 = smov %s4951_s16 }
 0x51c   : > { %s6640_s16 = smov %s4955_s17  ;;  %s6641_s17 = smov %s5127_s14 }
 0x51d   : > { %s6642_s18 = smov %s5111_s26  ;;  %24 = sbr.rel (!%p22_p0) target bundleno = 8 (0x8), region = 102 }
 0x524   :  { %2976 = vsyncpa [#allocation3], 1 }
 0x525   :  { %2978 = vsyncpa [#allocation3 + $0x1], 1 }
 0x526   :  { %2979 = vsyncpa [#allocation6], 1 }
 0x527   :  { %2980 = vsyncpa [#allocation4], 1 }
 0x528   :  { %2982 = vsyncpa [#allocation4 + $0x1], 1 }
 0x529   :  { %2983 = vsyncpa [#allocation10], 1 }
 0x52a   :  { %2985 = vsyncpa [#allocation10 + $0x1], 1 }

</bundles_post_ra>
